<compile_context>
chip_gen: v5e
topology: v5e:2x2
jax: 0.10.0
libtpu: 0.0.40
codegen_flags: <defaults>
</compile_context>

<pallas_src>
import dataclasses
import functools

import jax
import jax.numpy as jnp
from jax.experimental import pallas as pl
from jax.experimental.pallas import tpu as pltpu

_LANE = 128
_SUBLANE = 8


def _round_up(x: int, m: int) -> int:
    return ((x + m - 1) // m) * m


def _cdiv(a: int, b: int) -> int:
    return (a + b - 1) // b


# ---------------------------------------------------------------------------
# Kernel
# ---------------------------------------------------------------------------
def actor_kernel(x_ref, w1_ref, w2_ref, w3_ref, vecs_ref, b3_ref, o_ref,
                 *, hidden_real: int):
    inv_h = 1.0 / float(hidden_real)

    def layernorm(h, gamma, beta, eps=1e-5):
        # Single-pass stats; padded lanes of h are exactly 0, so dividing the
        # sums by the *real* hidden width gives the exact LayerNorm over the
        # real features.  Padded gamma/beta are 0 -> padded lanes stay 0.
        mean = jnp.sum(h, axis=-1, keepdims=True) * inv_h
        mean_sq = jnp.sum(h * h, axis=-1, keepdims=True) * inv_h
        var = jnp.maximum(mean_sq - mean * mean, 0.0)  # clamp: no NaN via rsqrt
        return (h - mean) * jax.lax.rsqrt(var + eps) * gamma + beta

    # Packed per-layer vectors (f32): rows are b1,g1,be1,b2,g2,be2.
    b1 = vecs_ref[0:1, :]
    g1 = vecs_ref[1:2, :]
    be1 = vecs_ref[2:3, :]
    b2 = vecs_ref[3:4, :]
    g2 = vecs_ref[4:5, :]
    be2 = vecs_ref[5:6, :]
    b3 = b3_ref[...]                       # (1, n_jobs)

    # x arrives unpadded f32; cast to the MXU dtype in-kernel (no HBM copy).
    x = x_ref[...].astype(w1_ref.dtype)

    # Layer 1: Linear + LayerNorm + ReLU (f32 accumulate / elementwise)
    h = jnp.dot(x, w1_ref[...], preferred_element_type=jnp.float32) + b1
    h = jnp.maximum(layernorm(h, g1, be1), 0.0)

    # Layer 2: Linear + LayerNorm + ReLU
    h = jnp.dot(h.astype(w2_ref.dtype), w2_ref[...],
                preferred_element_type=jnp.float32) + b2
    h = jnp.maximum(layernorm(h, g2, be2), 0.0)

    # Layer 3: Linear + Softplus (stable: max(y,0) + log1p(exp(-|y|)))
    y = jnp.dot(h.astype(w3_ref.dtype), w3_ref[...],
                preferred_element_type=jnp.float32) + b3
    sp = jnp.maximum(y, 0.0) + jnp.log1p(jnp.exp(-jnp.abs(y)))
    o_ref[...] = sp.astype(o_ref.dtype)


# ---------------------------------------------------------------------------
# One-time parameter preparation (padding + bf16 cast hoisted out of forward)
# ---------------------------------------------------------------------------
@dataclasses.dataclass(frozen=True)
class ActorPaddedParams:
    w1: jax.Array        # (n_traits, h_pad)   compute dtype
    w2: jax.Array        # (h_pad,   h_pad)    compute dtype
    w3: jax.Array        # (h_pad,   n_jobs)   compute dtype
    vecs: jax.Array      # (8, h_pad) f32 rows: b1,g1,be1,b2,g2,be2
    b3: jax.Array        # (1, n_jobs) f32
    hidden_real: int     # static: real hidden width (LayerNorm divisor)


def prepare_actor_params(params, compute_dtype=jnp.bfloat16) -> ActorPaddedParams:
    """Pad/cast the weights once; do NOT call this per forward pass."""
    n_traits, H = params["w1"].shape
    n_jobs = params["w3"].shape[1]
    h_pad = _round_up(H, _LANE)            # only the hidden dim needs lane padding

    w1_p = (jnp.zeros((n_traits, h_pad), compute_dtype)
            .at[:, :H].set(params["w1"].astype(compute_dtype)))
    w2_p = (jnp.zeros((h_pad, h_pad), compute_dtype)
            .at[:H, :H].set(params["w2"].astype(compute_dtype)))
    w3_p = (jnp.zeros((h_pad, n_jobs), compute_dtype)
            .at[:H, :].set(params["w3"].astype(compute_dtype)))

    vecs = jnp.zeros((8, h_pad), jnp.float32)
    for r, k in enumerate(("b1", "g1", "be1", "b2", "g2", "be2")):
        vecs = vecs.at[r, :H].set(params[k].reshape(-1))
    b3_p = params["b3"].reshape(1, n_jobs).astype(jnp.float32)

    return ActorPaddedParams(w1_p, w2_p, w3_p, vecs, b3_p, H)


# ---------------------------------------------------------------------------
# Forward wrapper
# ---------------------------------------------------------------------------
def actor_forward(state, padded: ActorPaddedParams, *, block_batch: int = 512,
                  out_dtype=jnp.float32):
    """state: [B, n_traits] f32 (unpadded); padded: from prepare_actor_params."""
    B, n_traits = state.shape
    assert n_traits == padded.w1.shape[0], "state feature dim mismatch"
    h_pad = padded.w2.shape[0]
    n_jobs = padded.w3.shape[1]

    # Batch tiling: aim for >=2 grid steps (v7x megacore) and bound batch
    # padding waste to <8 rows by re-deriving tb from the block count.
    tb0 = min(block_batch, max(_SUBLANE, _round_up(_cdiv(B, 2), _SUBLANE)))
    num_blocks = _cdiv(B, tb0)
    tb = _round_up(_cdiv(B, num_blocks), _SUBLANE)
    b_pad = tb * num_blocks

    x_in = state if b_pad == B else jnp.pad(state, ((0, b_pad - B), (0, 0)))

    # --- VMEM budget (weights x1 buffer, x/out tiles x2, f32 intermediates) --
    w_item = jnp.dtype(padded.w1.dtype).itemsize
    weight_bytes = (_round_up(n_traits, _SUBLANE) * h_pad * w_item
                    + h_pad * h_pad * w_item
                    + h_pad * _round_up(n_jobs, _LANE) * w_item
                    + 8 * h_pad * 4
                    + _SUBLANE * _round_up(n_jobs, _LANE) * 4)
    io_bytes = 2 * tb * (_round_up(n_traits, _LANE) * state.dtype.itemsize
                         + _round_up(n_jobs, _LANE) * jnp.dtype(out_dtype).itemsize)
    interm_bytes = 4 * tb * h_pad * 4
    need = weight_bytes + io_bytes + interm_bytes
    vmem_limit = int(min(max(32 << 20, int(1.5 * need) + (2 << 20)), 128 << 20))

    cost = pl.CostEstimate(
        flops=2 * b_pad * (n_traits * h_pad + h_pad * h_pad + h_pad * n_jobs),
        transcendentals=b_pad * (2 * n_jobs + 4),
        bytes_accessed=(x_in.size * x_in.dtype.itemsize
                        + (padded.w1.size + padded.w2.size + padded.w3.size) * w_item
                        + (padded.vecs.size + padded.b3.size) * 4
                        + b_pad * n_jobs * jnp.dtype(out_dtype).itemsize),
    )

    def build(weight_pipeline_mode):
        res_kw = ({} if weight_pipeline_mode is None
                  else {"pipeline_mode": weight_pipeline_mode})

        def resident(shape):
            # Grid-invariant operands: constant index_map, stay VMEM-resident.
            return pl.BlockSpec(shape, lambda i: (0, 0), **res_kw)

        return pl.pallas_call(
            functools.partial(actor_kernel, hidden_real=padded.hidden_real),
            out_shape=jax.ShapeDtypeStruct((b_pad, n_jobs), out_dtype),
            grid_spec=pltpu.PrefetchScalarGridSpec(
                num_scalar_prefetch=0,
                grid=(num_blocks,),
                in_specs=[
                    # Unpadded state tile: trailing block dim == full array dim.
                    pl.BlockSpec((tb, n_traits), lambda i: (i, 0)),
                    resident((n_traits, h_pad)),   # w1
                    resident((h_pad, h_pad)),      # w2
                    resident((h_pad, n_jobs)),     # w3
                    resident((8, h_pad)),          # packed b/gamma/beta
                    resident((1, n_jobs)),         # b3
                ],
                # Narrow output block (trailing dim == full n_jobs): no padded
                # f32 slab, no trailing feature slice.
                out_specs=pl.BlockSpec((tb, n_jobs), lambda i: (i, 0)),
            ),
            compiler_params=pltpu.CompilerParams(
                dimension_semantics=("parallel",),
                vmem_limit_bytes=vmem_limit),
            cost_estimate=cost,
        )

    operands = (x_in, padded.w1, padded.w2, padded.w3, padded.vecs, padded.b3)
    try:
        # Single-buffer the never-refetched weights (halves their VMEM cost).
        out = build(pl.Buffered(1))(*operands)
    except Exception:  # pragma: no cover - older JAX without pipeline_mode
        out = build(None)(*operands)

    return out if b_pad == B else out[:B]


# ---------------------------------------------------------------------------
# Deterministic parameter init (orthogonal_(gain=0.1) weights, zero biases,
# ones/zeros LayerNorm — matches the PyTorch module's init scheme).
# ---------------------------------------------------------------------------
def _orthogonal(key, out_dim, in_dim, gain=0.1):
    rows, cols = out_dim, in_dim
    a = jax.random.normal(key, (rows, cols), dtype=jnp.float32)
    transposed = rows < cols
    if transposed:
        a = a.T
    q, r = jnp.linalg.qr(a)
    d = jnp.diag(r)
    q = q * jnp.where(d == 0, 1.0, jnp.sign(d))
    if transposed:
        q = q.T
    return gain * q  # (out_dim, in_dim), PyTorch convention


def init_actor_params(key, n_traits, n_jobs, hidden_dim):
    k1, k2, k3 = jax.random.split(key, 3)
    # Stored transposed ([in, out]) so the kernel hot path is x @ W + b.
    w1 = _orthogonal(k1, hidden_dim, n_traits).T
    w2 = _orthogonal(k2, hidden_dim, hidden_dim).T
    w3 = _orthogonal(k3, n_jobs, hidden_dim).T
    return {
        "w1": w1, "b1": jnp.zeros((hidden_dim,), jnp.float32),
        "g1": jnp.ones((hidden_dim,), jnp.float32),
        "be1": jnp.zeros((hidden_dim,), jnp.float32),
        "w2": w2, "b2": jnp.zeros((hidden_dim,), jnp.float32),
        "g2": jnp.ones((hidden_dim,), jnp.float32),
        "be2": jnp.zeros((hidden_dim,), jnp.float32),
        "w3": w3, "b3": jnp.zeros((n_jobs,), jnp.float32),
    }


# ---------------------------------------------------------------------------
# Reference (pure JAX, f32) for sanity checking
# ---------------------------------------------------------------------------
def actor_reference(state, p):
    def ln(h, g, b, eps=1e-5):
        m = jnp.mean(h, axis=-1, keepdims=True)
        v = jnp.mean((h - m) ** 2, axis=-1, keepdims=True)
        return (h - m) / jnp.sqrt(v + eps) * g + b

    h = state @ p["w1"] + p["b1"]
    h = jnp.maximum(ln(h, p["g1"], p["be1"]), 0.0)
    h = h @ p["w2"] + p["b2"]
    h = jnp.maximum(ln(h, p["g2"], p["be2"]), 0.0)
    y = h @ p["w3"] + p["b3"]
    return jax.nn.softplus(y)


if __name__ == "__main__":
    B, N_TRAITS, HIDDEN, N_JOBS = 64, 16, 32, 8

    key = jax.random.PRNGKey(0)
    k_state, k_params = jax.random.split(key)

    state = jax.random.normal(k_state, (B, N_TRAITS), dtype=jnp.float32)
    params = init_actor_params(k_params, N_TRAITS, N_JOBS, HIDDEN)

    # One-time weight padding / bf16 cast (kept across forward calls).
    padded = prepare_actor_params(params)

    # block_batch=32 -> 2 grid steps, exercising the batch-tiled pipeline.
    out = actor_forward(state, padded, block_batch=32)
    out = jax.block_until_ready(out)

    ref = actor_reference(state, params)
    assert out.shape == (B, N_JOBS), out.shape
    # bf16 MXU inputs (f32 accumulation) -> loosened tolerance vs f32 reference.
    assert jnp.allclose(out, ref, atol=2e-2, rtol=2e-2), (
        "mismatch vs reference, max abs diff = "
        f"{float(jnp.max(jnp.abs(out - ref)))}")

    print("KERNEL_OK")
</pallas_src>

<mosaic_0001>
module attributes {stable_mosaic.version = 11 : i64} {
  func.func @actor_kernel(%arg0: i32, %arg1: memref<32x16xf32, #tpu.memory_space<vmem>>, %arg2: memref<16x128xbf16, #tpu.memory_space<vmem>>, %arg3: memref<128x128xbf16, #tpu.memory_space<vmem>>, %arg4: memref<128x8xbf16, #tpu.memory_space<vmem>>, %arg5: memref<8x128xf32, #tpu.memory_space<vmem>>, %arg6: memref<1x8xf32, #tpu.memory_space<vmem>>, %arg7: memref<32x8xf32, #tpu.memory_space<vmem>>) attributes {dimension_semantics = [#tpu.dimension_semantics<parallel>], iteration_bounds = array<i64: 2>, scalar_prefetch = 0 : i64, scratch_operands = 0 : i64, tpu.core_type = #tpu.core_type<tc>, window_params = [{transform_indices = @transform_0, window_bounds = array<i64: 32, 16>}, {pipeline_mode = #tpu.pipeline_mode<synchronous>, transform_indices = @transform_1, window_bounds = array<i64: 16, 128>}, {pipeline_mode = #tpu.pipeline_mode<synchronous>, transform_indices = @transform_2, window_bounds = array<i64: 128, 128>}, {pipeline_mode = #tpu.pipeline_mode<synchronous>, transform_indices = @transform_3, window_bounds = array<i64: 128, 8>}, {pipeline_mode = #tpu.pipeline_mode<synchronous>, transform_indices = @transform_4, window_bounds = array<i64: 8, 128>}, {pipeline_mode = #tpu.pipeline_mode<synchronous>, transform_indices = @transform_5, window_bounds = array<i64: 1, 8>}, {transform_indices = @transform_6, window_bounds = array<i64: 32, 8>}]} {
    %c0 = arith.constant 0 : index
    %c0_0 = arith.constant 0 : index
    %0 = vector.load %arg5[%c0, %c0_0] : memref<8x128xf32, #tpu.memory_space<vmem>>, vector<1x128xf32>
    %c1 = arith.constant 1 : index
    %c0_1 = arith.constant 0 : index
    %1 = vector.load %arg5[%c1, %c0_1] : memref<8x128xf32, #tpu.memory_space<vmem>>, vector<1x128xf32>
    %c2 = arith.constant 2 : index
    %c0_2 = arith.constant 0 : index
    %2 = vector.load %arg5[%c2, %c0_2] : memref<8x128xf32, #tpu.memory_space<vmem>>, vector<1x128xf32>
    %c3 = arith.constant 3 : index
    %c0_3 = arith.constant 0 : index
    %3 = vector.load %arg5[%c3, %c0_3] : memref<8x128xf32, #tpu.memory_space<vmem>>, vector<1x128xf32>
    %c4 = arith.constant 4 : index
    %c0_4 = arith.constant 0 : index
    %4 = vector.load %arg5[%c4, %c0_4] : memref<8x128xf32, #tpu.memory_space<vmem>>, vector<1x128xf32>
    %c5 = arith.constant 5 : index
    %c0_5 = arith.constant 0 : index
    %5 = vector.load %arg5[%c5, %c0_5] : memref<8x128xf32, #tpu.memory_space<vmem>>, vector<1x128xf32>
    %c0_6 = arith.constant 0 : index
    %c0_7 = arith.constant 0 : index
    %6 = vector.load %arg6[%c0_6, %c0_7] : memref<1x8xf32, #tpu.memory_space<vmem>>, vector<1x8xf32>
    %c0_8 = arith.constant 0 : index
    %c0_9 = arith.constant 0 : index
    %7 = vector.load %arg1[%c0_8, %c0_9] : memref<32x16xf32, #tpu.memory_space<vmem>>, vector<32x16xf32>
    %8 = arith.truncf %7 : vector<32x16xf32> to vector<32x16xbf16>
    %c0_10 = arith.constant 0 : index
    %c0_11 = arith.constant 0 : index
    %9 = vector.load %arg2[%c0_10, %c0_11] : memref<16x128xbf16, #tpu.memory_space<vmem>>, vector<16x128xbf16>
    %cst = arith.constant dense<0.000000e+00> : vector<32x128xf32>
    %10 = tpu.matmul %8, %9, %cst {dimension_numbers = #tpu.dot_dimension_numbers<[1], [0], [0], [1], [0, 0, 1, 1], [], []>} : vector<32x16xbf16>, vector<16x128xbf16>, vector<32x128xf32> -> vector<32x128xf32>
    %11 = vector.broadcast %0 : vector<1x128xf32> to vector<32x128xf32>
    %12 = arith.addf %10, %11 : vector<32x128xf32>
    %cst_12 = arith.constant dense<0.000000e+00> : vector<32xf32>
    %13 = vector.multi_reduction <add>, %12, %cst_12 [1] : vector<32x128xf32> to vector<32xf32>
    %14 = vector.shape_cast %13 : vector<32xf32> to vector<32x1xf32>
    %cst_13 = arith.constant 3.125000e-02 : f32
    %15 = vector.broadcast %cst_13 : f32 to vector<32x1xf32>
    %16 = arith.mulf %14, %15 : vector<32x1xf32>
    %17 = arith.mulf %12, %12 : vector<32x128xf32>
    %cst_14 = arith.constant dense<0.000000e+00> : vector<32xf32>
    %18 = vector.multi_reduction <add>, %17, %cst_14 [1] : vector<32x128xf32> to vector<32xf32>
    %19 = vector.shape_cast %18 : vector<32xf32> to vector<32x1xf32>
    %cst_15 = arith.constant 3.125000e-02 : f32
    %20 = vector.broadcast %cst_15 : f32 to vector<32x1xf32>
    %21 = arith.mulf %19, %20 : vector<32x1xf32>
    %22 = arith.mulf %16, %16 : vector<32x1xf32>
    %23 = arith.subf %21, %22 : vector<32x1xf32>
    %cst_16 = arith.constant 0.000000e+00 : f32
    %24 = vector.broadcast %cst_16 : f32 to vector<32x1xf32>
    %25 = arith.maximumf %23, %24 : vector<32x1xf32>
    %26 = vector.broadcast %16 : vector<32x1xf32> to vector<32x128xf32>
    %27 = arith.subf %12, %26 : vector<32x128xf32>
    %cst_17 = arith.constant 9.99999974E-6 : f32
    %28 = vector.broadcast %cst_17 : f32 to vector<32x1xf32>
    %29 = arith.addf %25, %28 : vector<32x1xf32>
    %30 = math.rsqrt %29 : vector<32x1xf32>
    %31 = vector.broadcast %30 : vector<32x1xf32> to vector<32x128xf32>
    %32 = arith.mulf %27, %31 : vector<32x128xf32>
    %33 = vector.broadcast %1 : vector<1x128xf32> to vector<32x128xf32>
    %34 = arith.mulf %32, %33 : vector<32x128xf32>
    %35 = vector.broadcast %2 : vector<1x128xf32> to vector<32x128xf32>
    %36 = arith.addf %34, %35 : vector<32x128xf32>
    %cst_18 = arith.constant 0.000000e+00 : f32
    %37 = vector.broadcast %cst_18 : f32 to vector<32x128xf32>
    %38 = arith.maximumf %36, %37 : vector<32x128xf32>
    %39 = arith.truncf %38 : vector<32x128xf32> to vector<32x128xbf16>
    %c0_19 = arith.constant 0 : index
    %c0_20 = arith.constant 0 : index
    %40 = vector.load %arg3[%c0_19, %c0_20] : memref<128x128xbf16, #tpu.memory_space<vmem>>, vector<128x128xbf16>
    %cst_21 = arith.constant dense<0.000000e+00> : vector<32x128xf32>
    %41 = tpu.matmul %39, %40, %cst_21 {dimension_numbers = #tpu.dot_dimension_numbers<[1], [0], [0], [1], [0, 0, 1, 1], [], []>} : vector<32x128xbf16>, vector<128x128xbf16>, vector<32x128xf32> -> vector<32x128xf32>
    %42 = vector.broadcast %3 : vector<1x128xf32> to vector<32x128xf32>
    %43 = arith.addf %41, %42 : vector<32x128xf32>
    %cst_22 = arith.constant dense<0.000000e+00> : vector<32xf32>
    %44 = vector.multi_reduction <add>, %43, %cst_22 [1] : vector<32x128xf32> to vector<32xf32>
    %45 = vector.shape_cast %44 : vector<32xf32> to vector<32x1xf32>
    %cst_23 = arith.constant 3.125000e-02 : f32
    %46 = vector.broadcast %cst_23 : f32 to vector<32x1xf32>
    %47 = arith.mulf %45, %46 : vector<32x1xf32>
    %48 = arith.mulf %43, %43 : vector<32x128xf32>
    %cst_24 = arith.constant dense<0.000000e+00> : vector<32xf32>
    %49 = vector.multi_reduction <add>, %48, %cst_24 [1] : vector<32x128xf32> to vector<32xf32>
    %50 = vector.shape_cast %49 : vector<32xf32> to vector<32x1xf32>
    %cst_25 = arith.constant 3.125000e-02 : f32
    %51 = vector.broadcast %cst_25 : f32 to vector<32x1xf32>
    %52 = arith.mulf %50, %51 : vector<32x1xf32>
    %53 = arith.mulf %47, %47 : vector<32x1xf32>
    %54 = arith.subf %52, %53 : vector<32x1xf32>
    %cst_26 = arith.constant 0.000000e+00 : f32
    %55 = vector.broadcast %cst_26 : f32 to vector<32x1xf32>
    %56 = arith.maximumf %54, %55 : vector<32x1xf32>
    %57 = vector.broadcast %47 : vector<32x1xf32> to vector<32x128xf32>
    %58 = arith.subf %43, %57 : vector<32x128xf32>
    %cst_27 = arith.constant 9.99999974E-6 : f32
    %59 = vector.broadcast %cst_27 : f32 to vector<32x1xf32>
    %60 = arith.addf %56, %59 : vector<32x1xf32>
    %61 = math.rsqrt %60 : vector<32x1xf32>
    %62 = vector.broadcast %61 : vector<32x1xf32> to vector<32x128xf32>
    %63 = arith.mulf %58, %62 : vector<32x128xf32>
    %64 = vector.broadcast %4 : vector<1x128xf32> to vector<32x128xf32>
    %65 = arith.mulf %63, %64 : vector<32x128xf32>
    %66 = vector.broadcast %5 : vector<1x128xf32> to vector<32x128xf32>
    %67 = arith.addf %65, %66 : vector<32x128xf32>
    %cst_28 = arith.constant 0.000000e+00 : f32
    %68 = vector.broadcast %cst_28 : f32 to vector<32x128xf32>
    %69 = arith.maximumf %67, %68 : vector<32x128xf32>
    %70 = arith.truncf %69 : vector<32x128xf32> to vector<32x128xbf16>
    %c0_29 = arith.constant 0 : index
    %c0_30 = arith.constant 0 : index
    %71 = vector.load %arg4[%c0_29, %c0_30] : memref<128x8xbf16, #tpu.memory_space<vmem>>, vector<128x8xbf16>
    %cst_31 = arith.constant dense<0.000000e+00> : vector<32x8xf32>
    %72 = tpu.matmul %70, %71, %cst_31 {dimension_numbers = #tpu.dot_dimension_numbers<[1], [0], [0], [1], [0, 0, 1, 1], [], []>} : vector<32x128xbf16>, vector<128x8xbf16>, vector<32x8xf32> -> vector<32x8xf32>
    %73 = vector.broadcast %6 : vector<1x8xf32> to vector<32x8xf32>
    %74 = arith.addf %72, %73 : vector<32x8xf32>
    %cst_32 = arith.constant 0.000000e+00 : f32
    %75 = vector.broadcast %cst_32 : f32 to vector<32x8xf32>
    %76 = arith.maximumf %74, %75 : vector<32x8xf32>
    %77 = math.absf %74 : vector<32x8xf32>
    %cst_33 = arith.constant 0.000000e+00 : f32
    %78 = vector.broadcast %cst_33 : f32 to vector<32x8xf32>
    %79 = arith.subf %78, %77 : vector<32x8xf32>
    %80 = math.exp %79 : vector<32x8xf32>
    %81 = math.log1p %80 : vector<32x8xf32>
    %82 = arith.addf %76, %81 : vector<32x8xf32>
    %c0_34 = arith.constant 0 : index
    %c0_35 = arith.constant 0 : index
    %83 = vector.load %arg7[%c0_34, %c0_35] : memref<32x8xf32, #tpu.memory_space<vmem>>, vector<32x8xf32>
    tpu.vector_store %arg7[%c0_34, %c0_35], %82 {strides = array<i32>} : memref<32x8xf32, #tpu.memory_space<vmem>>, vector<32x8xf32>,
    return
  }
  func.func @transform_0(%arg0: i32) -> (i32, i32) {
    %c0_i32 = arith.constant 0 : i32
    %c0_i32_0 = arith.constant 0 : i32
    return %arg0, %c0_i32 : i32, i32
  }
  func.func @transform_1(%arg0: i32) -> (i32, i32) {
    %c0_i32 = arith.constant 0 : i32
    %c0_i32_0 = arith.constant 0 : i32
    %c0_i32_1 = arith.constant 0 : i32
    return %c0_i32, %c0_i32_0 : i32, i32
  }
  func.func @transform_2(%arg0: i32) -> (i32, i32) {
    %c0_i32 = arith.constant 0 : i32
    %c0_i32_0 = arith.constant 0 : i32
    %c0_i32_1 = arith.constant 0 : i32
    return %c0_i32, %c0_i32_0 : i32, i32
  }
  func.func @transform_3(%arg0: i32) -> (i32, i32) {
    %c0_i32 = arith.constant 0 : i32
    %c0_i32_0 = arith.constant 0 : i32
    %c0_i32_1 = arith.constant 0 : i32
    return %c0_i32, %c0_i32_0 : i32, i32
  }
  func.func @transform_4(%arg0: i32) -> (i32, i32) {
    %c0_i32 = arith.constant 0 : i32
    %c0_i32_0 = arith.constant 0 : i32
    %c0_i32_1 = arith.constant 0 : i32
    return %c0_i32, %c0_i32_0 : i32, i32
  }
  func.func @transform_5(%arg0: i32) -> (i32, i32) {
    %c0_i32 = arith.constant 0 : i32
    %c0_i32_0 = arith.constant 0 : i32
    %c0_i32_1 = arith.constant 0 : i32
    return %c0_i32, %c0_i32_0 : i32, i32
  }
  func.func @transform_6(%arg0: i32) -> (i32, i32) {
    %c0_i32 = arith.constant 0 : i32
    %c0_i32_0 = arith.constant 0 : i32
    return %arg0, %c0_i32 : i32, i32
  }
}

module attributes {stable_mosaic.version = 11 : i64} {
  func.func @actor_kernel(%arg0: i32, %arg1: memref<32x16xf32, #tpu.memory_space<vmem>>, %arg2: memref<16x128xbf16, #tpu.memory_space<vmem>>, %arg3: memref<128x128xbf16, #tpu.memory_space<vmem>>, %arg4: memref<128x8xbf16, #tpu.memory_space<vmem>>, %arg5: memref<8x128xf32, #tpu.memory_space<vmem>>, %arg6: memref<1x8xf32, #tpu.memory_space<vmem>>, %arg7: memref<32x8xf32, #tpu.memory_space<vmem>>) attributes {dimension_semantics = [#tpu.dimension_semantics<parallel>], iteration_bounds = array<i64: 2>, scalar_prefetch = 0 : i64, scratch_operands = 0 : i64, tpu.core_type = #tpu.core_type<tc>, window_params = [{transform_indices = @transform_0, window_bounds = array<i64: 32, 16>}, {pipeline_mode = #tpu.pipeline_mode<synchronous>, transform_indices = @transform_1, window_bounds = array<i64: 16, 128>}, {pipeline_mode = #tpu.pipeline_mode<synchronous>, transform_indices = @transform_2, window_bounds = array<i64: 128, 128>}, {pipeline_mode = #tpu.pipeline_mode<synchronous>, transform_indices = @transform_3, window_bounds = array<i64: 128, 8>}, {pipeline_mode = #tpu.pipeline_mode<synchronous>, transform_indices = @transform_4, window_bounds = array<i64: 8, 128>}, {pipeline_mode = #tpu.pipeline_mode<synchronous>, transform_indices = @transform_5, window_bounds = array<i64: 1, 8>}, {transform_indices = @transform_6, window_bounds = array<i64: 32, 8>}]} {
    %c0 = arith.constant 0 : index
    %c0_0 = arith.constant 0 : index
    %0 = vector.load %arg5[%c0, %c0_0] : memref<8x128xf32, #tpu.memory_space<vmem>>, vector<1x128xf32>
    %c1 = arith.constant 1 : index
    %c0_1 = arith.constant 0 : index
    %1 = vector.load %arg5[%c1, %c0_1] : memref<8x128xf32, #tpu.memory_space<vmem>>, vector<1x128xf32>
    %c2 = arith.constant 2 : index
    %c0_2 = arith.constant 0 : index
    %2 = vector.load %arg5[%c2, %c0_2] : memref<8x128xf32, #tpu.memory_space<vmem>>, vector<1x128xf32>
    %c3 = arith.constant 3 : index
    %c0_3 = arith.constant 0 : index
    %3 = vector.load %arg5[%c3, %c0_3] : memref<8x128xf32, #tpu.memory_space<vmem>>, vector<1x128xf32>
    %c4 = arith.constant 4 : index
    %c0_4 = arith.constant 0 : index
    %4 = vector.load %arg5[%c4, %c0_4] : memref<8x128xf32, #tpu.memory_space<vmem>>, vector<1x128xf32>
    %c5 = arith.constant 5 : index
    %c0_5 = arith.constant 0 : index
    %5 = vector.load %arg5[%c5, %c0_5] : memref<8x128xf32, #tpu.memory_space<vmem>>, vector<1x128xf32>
    %c0_6 = arith.constant 0 : index
    %c0_7 = arith.constant 0 : index
    %6 = vector.load %arg6[%c0_6, %c0_7] : memref<1x8xf32, #tpu.memory_space<vmem>>, vector<1x8xf32>
    %c0_8 = arith.constant 0 : index
    %c0_9 = arith.constant 0 : index
    %7 = vector.load %arg1[%c0_8, %c0_9] : memref<32x16xf32, #tpu.memory_space<vmem>>, vector<32x16xf32>
    %8 = arith.truncf %7 : vector<32x16xf32> to vector<32x16xbf16>
    %c0_10 = arith.constant 0 : index
    %c0_11 = arith.constant 0 : index
    %9 = vector.load %arg2[%c0_10, %c0_11] : memref<16x128xbf16, #tpu.memory_space<vmem>>, vector<16x128xbf16>
    %cst = arith.constant dense<0.000000e+00> : vector<32x128xf32>
    %10 = tpu.matmul %8, %9, %cst {dimension_numbers = #tpu.dot_dimension_numbers<[1], [0], [0], [1], [0, 0, 1, 1], [], []>} : vector<32x16xbf16>, vector<16x128xbf16>, vector<32x128xf32> -> vector<32x128xf32>
    %11 = vector.broadcast %0 : vector<1x128xf32> to vector<32x128xf32>
    %12 = arith.addf %10, %11 : vector<32x128xf32>
    %cst_12 = arith.constant dense<0.000000e+00> : vector<32xf32>
    %13 = vector.multi_reduction <add>, %12, %cst_12 [1] : vector<32x128xf32> to vector<32xf32>
    %14 = vector.shape_cast %13 : vector<32xf32> to vector<32x1xf32>
    %cst_13 = arith.constant 3.125000e-02 : f32
    %15 = vector.broadcast %cst_13 : f32 to vector<32x1xf32>
    %16 = arith.mulf %14, %15 : vector<32x1xf32>
    %17 = arith.mulf %12, %12 : vector<32x128xf32>
    %cst_14 = arith.constant dense<0.000000e+00> : vector<32xf32>
    %18 = vector.multi_reduction <add>, %17, %cst_14 [1] : vector<32x128xf32> to vector<32xf32>
    %19 = vector.shape_cast %18 : vector<32xf32> to vector<32x1xf32>
    %cst_15 = arith.constant 3.125000e-02 : f32
    %20 = vector.broadcast %cst_15 : f32 to vector<32x1xf32>
    %21 = arith.mulf %19, %20 : vector<32x1xf32>
    %22 = arith.mulf %16, %16 : vector<32x1xf32>
    %23 = arith.subf %21, %22 : vector<32x1xf32>
    %cst_16 = arith.constant 0.000000e+00 : f32
    %24 = vector.broadcast %cst_16 : f32 to vector<32x1xf32>
    %25 = arith.maximumf %23, %24 : vector<32x1xf32>
    %26 = vector.broadcast %16 : vector<32x1xf32> to vector<32x128xf32>
    %27 = arith.subf %12, %26 : vector<32x128xf32>
    %cst_17 = arith.constant 9.99999974E-6 : f32
    %28 = vector.broadcast %cst_17 : f32 to vector<32x1xf32>
    %29 = arith.addf %25, %28 : vector<32x1xf32>
    %30 = math.rsqrt %29 : vector<32x1xf32>
    %31 = vector.broadcast %30 : vector<32x1xf32> to vector<32x128xf32>
    %32 = arith.mulf %27, %31 : vector<32x128xf32>
    %33 = vector.broadcast %1 : vector<1x128xf32> to vector<32x128xf32>
    %34 = arith.mulf %32, %33 : vector<32x128xf32>
    %35 = vector.broadcast %2 : vector<1x128xf32> to vector<32x128xf32>
    %36 = arith.addf %34, %35 : vector<32x128xf32>
    %cst_18 = arith.constant 0.000000e+00 : f32
    %37 = vector.broadcast %cst_18 : f32 to vector<32x128xf32>
    %38 = arith.maximumf %36, %37 : vector<32x128xf32>
    %39 = arith.truncf %38 : vector<32x128xf32> to vector<32x128xbf16>
    %c0_19 = arith.constant 0 : index
    %c0_20 = arith.constant 0 : index
    %40 = vector.load %arg3[%c0_19, %c0_20] : memref<128x128xbf16, #tpu.memory_space<vmem>>, vector<128x128xbf16>
    %cst_21 = arith.constant dense<0.000000e+00> : vector<32x128xf32>
    %41 = tpu.matmul %39, %40, %cst_21 {dimension_numbers = #tpu.dot_dimension_numbers<[1], [0], [0], [1], [0, 0, 1, 1], [], []>} : vector<32x128xbf16>, vector<128x128xbf16>, vector<32x128xf32> -> vector<32x128xf32>
    %42 = vector.broadcast %3 : vector<1x128xf32> to vector<32x128xf32>
    %43 = arith.addf %41, %42 : vector<32x128xf32>
    %cst_22 = arith.constant dense<0.000000e+00> : vector<32xf32>
    %44 = vector.multi_reduction <add>, %43, %cst_22 [1] : vector<32x128xf32> to vector<32xf32>
    %45 = vector.shape_cast %44 : vector<32xf32> to vector<32x1xf32>
    %cst_23 = arith.constant 3.125000e-02 : f32
    %46 = vector.broadcast %cst_23 : f32 to vector<32x1xf32>
    %47 = arith.mulf %45, %46 : vector<32x1xf32>
    %48 = arith.mulf %43, %43 : vector<32x128xf32>
    %cst_24 = arith.constant dense<0.000000e+00> : vector<32xf32>
    %49 = vector.multi_reduction <add>, %48, %cst_24 [1] : vector<32x128xf32> to vector<32xf32>
    %50 = vector.shape_cast %49 : vector<32xf32> to vector<32x1xf32>
    %cst_25 = arith.constant 3.125000e-02 : f32
    %51 = vector.broadcast %cst_25 : f32 to vector<32x1xf32>
    %52 = arith.mulf %50, %51 : vector<32x1xf32>
    %53 = arith.mulf %47, %47 : vector<32x1xf32>
    %54 = arith.subf %52, %53 : vector<32x1xf32>
    %cst_26 = arith.constant 0.000000e+00 : f32
    %55 = vector.broadcast %cst_26 : f32 to vector<32x1xf32>
    %56 = arith.maximumf %54, %55 : vector<32x1xf32>
    %57 = vector.broadcast %47 : vector<32x1xf32> to vector<32x128xf32>
    %58 = arith.subf %43, %57 : vector<32x128xf32>
    %cst_27 = arith.constant 9.99999974E-6 : f32
    %59 = vector.broadcast %cst_27 : f32 to vector<32x1xf32>
    %60 = arith.addf %56, %59 : vector<32x1xf32>
    %61 = math.rsqrt %60 : vector<32x1xf32>
    %62 = vector.broadcast %61 : vector<32x1xf32> to vector<32x128xf32>
    %63 = arith.mulf %58, %62 : vector<32x128xf32>
    %64 = vector.broadcast %4 : vector<1x128xf32> to vector<32x128xf32>
    %65 = arith.mulf %63, %64 : vector<32x128xf32>
    %66 = vector.broadcast %5 : vector<1x128xf32> to vector<32x128xf32>
    %67 = arith.addf %65, %66 : vector<32x128xf32>
    %cst_28 = arith.constant 0.000000e+00 : f32
    %68 = vector.broadcast %cst_28 : f32 to vector<32x128xf32>
    %69 = arith.maximumf %67, %68 : vector<32x128xf32>
    %70 = arith.truncf %69 : vector<32x128xf32> to vector<32x128xbf16>
    %c0_29 = arith.constant 0 : index
    %c0_30 = arith.constant 0 : index
    %71 = vector.load %arg4[%c0_29, %c0_30] : memref<128x8xbf16, #tpu.memory_space<vmem>>, vector<128x8xbf16>
    %cst_31 = arith.constant dense<0.000000e+00> : vector<32x8xf32>
    %72 = tpu.matmul %70, %71, %cst_31 {dimension_numbers = #tpu.dot_dimension_numbers<[1], [0], [0], [1], [0, 0, 1, 1], [], []>} : vector<32x128xbf16>, vector<128x8xbf16>, vector<32x8xf32> -> vector<32x8xf32>
    %73 = vector.broadcast %6 : vector<1x8xf32> to vector<32x8xf32>
    %74 = arith.addf %72, %73 : vector<32x8xf32>
    %cst_32 = arith.constant 0.000000e+00 : f32
    %75 = vector.broadcast %cst_32 : f32 to vector<32x8xf32>
    %76 = arith.maximumf %74, %75 : vector<32x8xf32>
    %77 = math.absf %74 : vector<32x8xf32>
    %cst_33 = arith.constant 0.000000e+00 : f32
    %78 = vector.broadcast %cst_33 : f32 to vector<32x8xf32>
    %79 = arith.subf %78, %77 : vector<32x8xf32>
    %80 = math.exp %79 : vector<32x8xf32>
    %81 = math.log1p %80 : vector<32x8xf32>
    %82 = arith.addf %76, %81 : vector<32x8xf32>
    %c0_34 = arith.constant 0 : index
    %c0_35 = arith.constant 0 : index
    %83 = vector.load %arg7[%c0_34, %c0_35] : memref<32x8xf32, #tpu.memory_space<vmem>>, vector<32x8xf32>
    tpu.vector_store %arg7[%c0_34, %c0_35], %82 {strides = array<i32>} : memref<32x8xf32, #tpu.memory_space<vmem>>, vector<32x8xf32>,
    return
  }
  func.func @transform_0(%arg0: i32) -> (i32, i32) {
    %c0_i32 = arith.constant 0 : i32
    %c0_i32_0 = arith.constant 0 : i32
    return %arg0, %c0_i32 : i32, i32
  }
  func.func @transform_1(%arg0: i32) -> (i32, i32) {
    %c0_i32 = arith.constant 0 : i32
    %c0_i32_0 = arith.constant 0 : i32
    %c0_i32_1 = arith.constant 0 : i32
    return %c0_i32, %c0_i32_0 : i32, i32
  }
  func.func @transform_2(%arg0: i32) -> (i32, i32) {
    %c0_i32 = arith.constant 0 : i32
    %c0_i32_0 = arith.constant 0 : i32
    %c0_i32_1 = arith.constant 0 : i32
    return %c0_i32, %c0_i32_0 : i32, i32
  }
  func.func @transform_3(%arg0: i32) -> (i32, i32) {
    %c0_i32 = arith.constant 0 : i32
    %c0_i32_0 = arith.constant 0 : i32
    %c0_i32_1 = arith.constant 0 : i32
    return %c0_i32, %c0_i32_0 : i32, i32
  }
  func.func @transform_4(%arg0: i32) -> (i32, i32) {
    %c0_i32 = arith.constant 0 : i32
    %c0_i32_0 = arith.constant 0 : i32
    %c0_i32_1 = arith.constant 0 : i32
    return %c0_i32, %c0_i32_0 : i32, i32
  }
  func.func @transform_5(%arg0: i32) -> (i32, i32) {
    %c0_i32 = arith.constant 0 : i32
    %c0_i32_0 = arith.constant 0 : i32
    %c0_i32_1 = arith.constant 0 : i32
    return %c0_i32, %c0_i32_0 : i32, i32
  }
  func.func @transform_6(%arg0: i32) -> (i32, i32) {
    %c0_i32 = arith.constant 0 : i32
    %c0_i32_0 = arith.constant 0 : i32
    return %arg0, %c0_i32 : i32, i32
  }
}

</mosaic_0001>

<bundles_post_ra>
// kernel: tpu_custom_call.1
= control target key start
LH: loop header
LB: loop body
LE: loop exit
PB: predicated region body
PF: predicated region fallthrough
CT: control target
= control target key end

     0   :  { %s1015_s21 = smov 0   ;;  %s1217_s0 = inlined_call_operand.vmem [shape: f32[64,16], index: 0, kind: input, shape index: {}]   ;;  %s1218_s1 = inlined_call_operand.vmem [shape: bf16[16,128], index: 1, kind: input, shape index: {}]   ;;  %s1219_s2 = inlined_call_operand.vmem [shape: bf16[128,128], index: 2, kind: input, shape index: {}]   ;;  %s1220_s3 = inlined_call_operand.vmem [shape: bf16[128,8], index: 3, kind: input, shape index: {}]   ;;  %s1221_s4 = inlined_call_operand.vmem [shape: f32[8,128], index: 4, kind: input, shape index: {}]   ;;  %s1222_s5 = inlined_call_operand.vmem [shape: f32[1,8], index: 5, kind: input, shape index: {}]   ;;  %s1223_s6 = inlined_call_operand.vmem [shape: f32[64,8], index: 6, kind: output, shape index: {}]  }
   0x1 LB: > { %s811_s22 = sadd.s32 4294967295, %s978_s21   ;;  %p815_p0 = scmp.ge.s32.totalorder %s978_s21, 1  ;;  %s978_s21 = sphi %s1015_s21, %s16_s21  }
   0x2   : > { %p213_p1 = scmp.lt.s32.totalorder %s978_s21, 3 }
   0x4   : > { %p214_p2 = pnand %p815_p0, %p213_p1 }
   0x5   : > { %s816_s25 = sshll.u32 (!%p214_p2), %s811_s22, 2 }
   0x6   : > { %217 = sbr.rel (%p214_p2) target bundleno = 794 (0x31a), region = 44  ;;  %p244_p3 = scmp.lt.s32.totalorder (!%p214_p2), %s816_s25, 7 }
   0xb   : > { %v892_v0 = vld [vmem:[%s1218_s1] sm:$0xff]  ;;  %s1225_s25 = smov (!%p244_p3, %s816_s25), 7  ;;  %vm278_vm0 = vcmask 130048   ;;  %v900_v20 = vld [vmem:[%s1219_s2 + $0x38] sm:$0xff]  ;;  %v899_v21 = vld [vmem:[%s1219_s2 + $0x30] sm:$0xff] }
   0xc   : > { %292 = vmatpush.bf16.msra.mxu0 %v892_v0  ;;  %s817_s26 = sshll.u32 %s1225_s25, 3  ;;  %v933_v7 = vld [vmem:[%s1221_s4] ss:$0 sm:$0xff]  ;;  %909 = vmatpush.bf16.msra.mxu3 %v900_v20  ;;  %v898_v22 = vld [vmem:[%s1219_s2 + $0x28] sm:$0xff]  ;;  %v896_v24 = vld [vmem:[%s1219_s2 + $0x18] sm:$0xff] }
   0xd   : > { %s247_s29 = scalar_lea.vmem %s1217_s0, %s817_s26  ;;  %477 = vmatpush.bf16.msra.mxu1 %v900_v20  ;;  %v897_v23 = vld [vmem:[%s1219_s2 + $0x20] sm:$0xff]  ;;  %v895_v31 = vld [vmem:[%s1219_s2 + $0x10] sm:$0xff]  ;;  %v894_v34 = vld [vmem:[%s1219_s2 + $0x8] sm:$0xff]  ;;  %s1202_s12 = scalar_lea.vmem %s1223_s6, %s817_s26 }
   0xe   : > { %v263_v1 = vld [vmem:[%s247_s29] sm:$0xff]  ;;  %v264_v2 = vld [vmem:[%s247_s29 + $0x8] sm:$0xff]  ;;  %v265_v4 = vld [vmem:[%s247_s29 + $0x10] sm:$0xff] }
   0xf   : > { %v267_v3 = vpack.c.bf16 %v264_v2, %v263_v1  ;;  %v266_v5 = vld [vmem:[%s247_s29 + $0x18] sm:$0xff]  ;;  %v893_v39 = vld [vmem:[%s1219_s2] sm:$0xff] }
  0x10   : > { %v268_v6 = vpack.c.bf16 %v266_v5, %v265_v4  ;;  %910 = vmatpush.bf16.msra.mxu3 %v899_v21 }
  0x11   : > { %824 = vmatmul.msk.bf16.vlgmr.msra.gmra.mxu0 %vm278_vm0, %v267_v3  ;;  %478 = vmatpush.bf16.msra.mxu1 %v899_v21 }
  0x14   : > { %911 = vmatpush.bf16.msra.mxu3 %v898_v22 }
  0x15   : > { %479 = vmatpush.bf16.msra.mxu1 %v898_v22 }
  0x18   : > { %912 = vmatpush.bf16.msra.mxu3 %v897_v23 }
  0x19   : > { %480 = vmatpush.bf16.msra.mxu1 %v897_v23 }
  0x1c   : > { %913 = vmatpush.bf16.msra.mxu3 %v896_v24 }
  0x1d   : > { %481 = vmatpush.bf16.msra.mxu1 %v896_v24 }
  0x20   : > { %914 = vmatpush.bf16.msra.mxu3 %v895_v31 }
  0x21   : > { %825 = vmatmul.msk.bf16.gmra.mxu0 %vm278_vm0, %v268_v6  ;;  %482 = vmatpush.bf16.msra.mxu1 %v895_v31 }
  0x24   : > { %915 = vmatpush.bf16.msra.mxu3 %v894_v34 }
  0x25   : > { %483 = vmatpush.bf16.msra.mxu1 %v894_v34 }
  0x28   : > { %916 = vmatpush.bf16.msra.mxu3 %v893_v39 }
  0x29   : > { %484 = vmatpush.bf16.msra.mxu1 %v893_v39 }
  0x8e   : > { %v294_v8 = vpop.f32.mrf.mxu0 }
  0x8f   : > { %v1037_v9 = vadd.f32 %v933_v7, %v294_v8 }
  0x91   : > { %304 = vadd.xlane.f32.xlu2 %v1037_v9  ;;  %v316_v18 = vmul.f32 %v1037_v9, %v1037_v9 }
  0x96   : > { %v296_v10 = vpop.f32.mrf.mxu0 }
  0x97   : > { %v1040_v11 = vadd.f32 %v933_v7, %v296_v10 }
  0x99   : > { %306 = vadd.xlane.f32.xlu2 %v1040_v11  ;;  %v317_v19 = vmul.f32 %v1040_v11, %v1040_v11 }
  0x9e   : > { %v299_v12 = vpop.f32.mrf.mxu0 }
  0x9f   : > { %v1043_v13 = vadd.f32 %v933_v7, %v299_v12  ;;  %v934_v12 = vld [vmem:[%s1221_s4 + $0x1] ss:$0 sm:$0xff] }
  0xa1   : > { %308 = vadd.xlane.f32.xlu0 %v1043_v13  ;;  %v318_v14 = vmul.f32 %v1043_v13, %v1043_v13 }
  0xa3   : > { %324 = vadd.xlane.f32.xlu1 %v318_v14 }
  0xa6   : > { %v301_v15 = vpop.f32.mrf.mxu0 }
  0xa7   : > { %v1048_v16 = vadd.f32 %v933_v7, %v301_v15 }
  0xa9   : > { %310 = vadd.xlane.f32.xlu0 %v1048_v16  ;;  %v319_v17 = vmul.f32 %v1048_v16, %v1048_v16 }
  0xab   : > { %326 = vadd.xlane.f32.xlu1 %v319_v17 }
  0xb1   : > { %320 = vadd.xlane.f32.xlu0 %v316_v18 }
  0xb3   : > { %322 = vadd.xlane.f32.xlu1 %v317_v19 }
 0x104   : > { %v305_v27 = vpop.xlane.xlu2 %304 }
 0x105   : > { %v1089_v43 = vmul.f32 0.03125, %v305_v27 }
 0x107   : > { %v332_v49 = vmul.f32 %v1089_v43, %v1089_v43 }
 0x10c   : > { %v307_v41 = vpop.xlane.xlu2 %306 }
 0x10d   : > { %v1091_v45 = vmul.f32 0.03125, %v307_v41 }
 0x10f   : > { %v333_v54 = vmul.f32 %v1091_v45, %v1091_v45 }
 0x114   : > { %v309_v25 = vpop.xlane.xlu0 %308 }
 0x115   : > { %v1072_v26 = vmul.f32 0.03125, %v309_v25 }
 0x116   : > { %v325_v28 = vpop.xlane.xlu1 %324 }
 0x117   : > { %v334_v29 = vmul.f32 %v1072_v26, %v1072_v26  ;;  %v330_v30 = vmul.f32 0.03125, %v325_v28  ;;  %v346_v5 = vsub.f32 %v1043_v13, %v1072_v26  ;;  %v935_v13 = vld [vmem:[%s1221_s4 + $0x2] ss:$0 sm:$0xff] }
 0x119   : > { %v338_v32 = vsub.f32 %v330_v30, %v334_v29 }
 0x11b   : > { %v342_v33 = vmax.f32 %v338_v32, 0.0 }
 0x11c   : > { %v311_v35 = vpop.xlane.xlu0 %310 }
 0x11d   : > { %v350_v36 = vadd.f32 1e-05, %v342_v33  ;;  %v1082_v37 = vmul.f32 0.03125, %v311_v35  ;;  %v344_v33 = vsub.f32 %v1037_v9, %v1089_v43 }
 0x11e   : > { %v327_v38 = vpop.xlane.xlu1 %326 }
 0x11f   : > { %940 = vrsqrt.f32 %v350_v36  ;;  %v335_v40 = vmul.f32 %v1082_v37, %v1082_v37  ;;  %v331_v42 = vmul.f32 0.03125, %v327_v38  ;;  %vm378_vm2 = vweird.f32 %v350_v36 }
 0x120   : > { %v347_v22 = vsub.f32 %v1048_v16, %v1082_v37 }
 0x121   : > { %v339_v44 = vsub.f32 %v331_v42, %v335_v40 }
 0x123   : > { %v343_v46 = vmax.f32 %v339_v44, 0.0 }
 0x124   : > { %v321_v47 = vpop.xlane.xlu0 %320 }
 0x125   : > { %v941_v48 = vpop.eup %940  ;;  %v328_v50 = vmul.f32 0.03125, %v321_v47  ;;  %v351_v52 = vadd.f32 1e-05, %v343_v46 }
 0x126   : > { %v373_v51 = vmul.f32 %v941_v48, %v350_v36  ;;  %v323_v53 = vpop.xlane.xlu1 %322  ;;  %vm379_vm1 = vweird.f32 %v941_v48  ;;  %v345_v36 = vsub.f32 %v1040_v11, %v1091_v45  ;;  %v936_v11 = vld [vmem:[%s1221_s4 + $0x3] ss:$0 sm:$0xff] }
 0x127   : > { %v336_v55 = vsub.f32 %v328_v50, %v332_v49  ;;  %v329_v56 = vmul.f32 0.03125, %v323_v53  ;;  %942 = vrsqrt.f32 %v351_v52  ;;  %vm380_vm3 = vmor %vm378_vm2, %vm379_vm1  ;;  %vm388_vm5 = vweird.f32 %v351_v52 }
 0x128   : > { %v374_v57 = vmul.f32 %v941_v48, %v373_v51 }
 0x129   : > { %v340_v58 = vmax.f32 %v336_v55, 0.0  ;;  %v337_v59 = vsub.f32 %v329_v56, %v333_v54 }
 0x12a   : > { %v375_v60 = vmul.f32 0.5, %v374_v57 }
 0x12b   : > { %v348_v61 = vadd.f32 1e-05, %v340_v58  ;;  %v341_v62 = vmax.f32 %v337_v59, 0.0 }
 0x12c   : > { %v376_v63 = vsub.f32 1.5, %v375_v60 }
 0x12d   : > { %944 = vrsqrt.f32 %v348_v61  ;;  %v349_v0 = vadd.f32 1e-05, %v341_v62  ;;  %v943_v1 = vpop.eup %942  ;;  %vm358_vm8 = vweird.f32 %v348_v61  ;;  %v907_v62 = vld [vmem:[%s1220_s3 + $0x30] sm:$0xff] }
 0x12e   : > { %v377_v2 = vmul.f32 %v941_v48, %v376_v63  ;;  %v383_v3 = vmul.f32 %v943_v1, %v351_v52  ;;  %vm389_vm4 = vweird.f32 %v943_v1  ;;  %v906_v63 = vld [vmem:[%s1220_s3 + $0x28] sm:$0xff] }
 0x12f   : > { %946 = vrsqrt.f32 %v349_v0  ;;  %vm390_vm6 = vmor %vm388_vm5, %vm389_vm4  ;;  %vm368_vm11 = vweird.f32 %v349_v0 }
 0x130   : > { %v381_v4 = vsel %vm380_vm3, %v941_v48, %v377_v2  ;;  %v384_v6 = vmul.f32 %v943_v1, %v383_v3  ;;  %v904_v2 = vld [vmem:[%s1220_s3 + $0x18] sm:$0xff] }
 0x131   : > { %v394_v10 = vmul.f32 %v381_v4, %v346_v5 }
 0x132   : > { %v385_v8 = vmul.f32 0.5, %v384_v6 }
 0x133   : > { %v945_v7 = vpop.eup %944  ;;  %v399_v21 = vmul.f32 %v934_v12, %v394_v10 }
 0x134   : > { %v353_v14 = vmul.f32 %v945_v7, %v348_v61  ;;  %v386_v17 = vsub.f32 1.5, %v385_v8  ;;  %vm359_vm7 = vweird.f32 %v945_v7  ;;  %v908_v61 = vld [vmem:[%s1220_s3 + $0x38] sm:$0xff]  ;;  %v903_v8 = vld [vmem:[%s1220_s3 + $0x10] sm:$0xff] }
 0x135   : > { %v947_v15 = vpop.eup %946  ;;  %v404_v29 = vadd.f32 %v935_v13, %v399_v21  ;;  %vm360_vm10 = vmor %vm358_vm8, %vm359_vm7  ;;  %917 = vmatpush.bf16.msra.mxu2 %v908_v61  ;;  %671 = vmatpush.bf16.msrb.mxu0 %v908_v61 }
 0x136   : > { %v354_v18 = vmul.f32 %v945_v7, %v353_v14  ;;  %v363_v19 = vmul.f32 %v947_v15, %v349_v0  ;;  %v387_v20 = vmul.f32 %v943_v1, %v386_v17  ;;  %vm369_vm9 = vweird.f32 %v947_v15  ;;  %v905_v0 = vld [vmem:[%s1220_s3 + $0x20] sm:$0xff]  ;;  %v902_v14 = vld [vmem:[%s1220_s3 + $0x8] sm:$0xff] }
 0x137   : > { %vm370_vm12 = vmor %vm368_vm11, %vm369_vm9  ;;  %v408_v38 = vmax.f32 %v404_v29, 0.0 }
 0x138   : > { %v355_v23 = vmul.f32 0.5, %v354_v18  ;;  %v364_v24 = vmul.f32 %v947_v15, %v363_v19  ;;  %v391_v25 = vsel %vm390_vm6, %v943_v1, %v387_v20 }
 0x139   : > { %v395_v28 = vmul.f32 %v391_v25, %v347_v22  ;;  %918 = vmatpush.bf16.msra.mxu2 %v907_v62  ;;  %672 = vmatpush.bf16.msrb.mxu0 %v907_v62  ;;  %v901_v22 = vld [vmem:[%s1220_s3] sm:$0xff] }
 0x13a   : > { %v356_v26 = vsub.f32 1.5, %v355_v23  ;;  %v365_v27 = vmul.f32 0.5, %v364_v24 }
 0x13b   : > { %v400_v32 = vmul.f32 %v934_v12, %v395_v28 }
 0x13c   : > { %v357_v30 = vmul.f32 %v945_v7, %v356_v26  ;;  %v366_v31 = vsub.f32 1.5, %v365_v27 }
 0x13d   : > { %v405_v16 = vadd.f32 %v935_v13, %v400_v32  ;;  %919 = vmatpush.bf16.msra.mxu2 %v906_v63  ;;  %673 = vmatpush.bf16.msrb.mxu0 %v906_v63 }
 0x13e   : > { %v367_v34 = vmul.f32 %v947_v15, %v366_v31  ;;  %v361_v35 = vsel %vm360_vm10, %v945_v7, %v357_v30  ;;  %vm750_vm10 = vcmask 64512  }
 0x13f   : > { %v392_v37 = vmul.f32 %v361_v35, %v344_v33  ;;  %v409_v39 = vmax.f32 %v405_v16, 0.0 }
 0x140   : > { %v371_v40 = vsel %vm370_vm12, %v947_v15, %v367_v34 }
 0x141   : > { %v393_v41 = vmul.f32 %v371_v40, %v345_v36  ;;  %v397_v42 = vmul.f32 %v934_v12, %v392_v37  ;;  %v411_v44 = vpack.c.bf16 %v409_v39, %v408_v38  ;;  %920 = vmatpush.bf16.msra.mxu2 %v905_v0  ;;  %674 = vmatpush.bf16.msrb.mxu0 %v905_v0  ;;  %v938_v0 = vld [vmem:[%s1221_s4 + $0x5] ss:$0 sm:$0xff] }
 0x143   : > { %v398_v46 = vmul.f32 %v934_v12, %v393_v41  ;;  %v402_v47 = vadd.f32 %v935_v13, %v397_v42  ;;  %490 = vmatmul.bf16.vlgmr.msra.gmra.mxu3 %v411_v44 }
 0x145   : > { %v403_v9 = vadd.f32 %v935_v13, %v398_v46  ;;  %v406_v43 = vmax.f32 %v402_v47, 0.0  ;;  %921 = vmatpush.bf16.msra.mxu2 %v904_v2  ;;  %675 = vmatpush.bf16.msrb.mxu0 %v904_v2 }
 0x147   : > { %v407_v48 = vmax.f32 %v403_v9, 0.0 }
 0x149   : > { %v410_v49 = vpack.c.bf16 %v407_v48, %v406_v43  ;;  %922 = vmatpush.bf16.msra.mxu2 %v903_v8  ;;  %676 = vmatpush.bf16.msrb.mxu0 %v903_v8 }
 0x14b   : > { %485 = vmatmul.bf16.vlgmr.msra.gmra.mxu1 %v410_v49 }
 0x14d   : > { %923 = vmatpush.bf16.msra.mxu2 %v902_v14  ;;  %677 = vmatpush.bf16.msrb.mxu0 %v902_v14 }
 0x151   : > { %924 = vmatpush.bf16.msra.mxu2 %v901_v22  ;;  %678 = vmatpush.bf16.msrb.mxu0 %v901_v22 }
 0x1c6   : > { %v491_v45 = vpop.f32.mrf.mxu3 }
 0x1c7   : > { %v1114_v50 = vadd.f32 %v936_v11, %v491_v45 }
 0x1c8   : > { %v486_v51 = vpop.f32.mrf.mxu1 }
 0x1c9   : > { %v1116_v52 = vadd.f32 %v936_v11, %v486_v51  ;;  %500 = vadd.xlane.f32.xlu2 %v1114_v50  ;;  %v510_v53 = vmul.f32 %v1114_v50, %v1114_v50 }
 0x1cb   : > { %496 = vadd.xlane.f32.xlu0 %v1116_v52  ;;  %516 = vadd.xlane.f32.xlu1 %v510_v53  ;;  %v508_v60 = vmul.f32 %v1116_v52, %v1116_v52  ;;  %v937_v53 = vld [vmem:[%s1221_s4 + $0x4] ss:$0 sm:$0xff] }
 0x1ce   : > { %v493_v54 = vpop.f32.mrf.mxu3 }
 0x1cf   : > { %v1122_v55 = vadd.f32 %v936_v11, %v493_v54 }
 0x1d0   : > { %v488_v56 = vpop.f32.mrf.mxu1 }
 0x1d1   : > { %v1124_v57 = vadd.f32 %v936_v11, %v488_v56  ;;  %v511_v58 = vmul.f32 %v1122_v55, %v1122_v55 }
 0x1d3   : > { %502 = vadd.xlane.f32.xlu0 %v1122_v55  ;;  %518 = vadd.xlane.f32.xlu2 %v511_v58  ;;  %v509_v59 = vmul.f32 %v1124_v57, %v1124_v57 }
 0x1d4   : > { %498 = vadd.xlane.f32.xlu1 %v1124_v57 }
 0x1db   : > { %514 = vadd.xlane.f32.xlu0 %v509_v59  ;;  %512 = vadd.xlane.f32.xlu2 %v508_v60 }
 0x23c   : > { %v501_v1 = vpop.xlane.xlu2 %500 }
 0x23d   : > { %v1149_v3 = vmul.f32 0.03125, %v501_v1 }
 0x23e   : > { %v497_v4 = vpop.xlane.xlu0 %496  ;;  %v517_v5 = vpop.xlane.xlu1 %516 }
 0x23f   : > { %v526_v6 = vmul.f32 %v1149_v3, %v1149_v3  ;;  %v522_v7 = vmul.f32 0.03125, %v517_v5  ;;  %v1168_v25 = vmul.f32 0.03125, %v497_v4  ;;  %v538_v49 = vsub.f32 %v1114_v50, %v1149_v3 }
 0x241   : > { %v530_v10 = vsub.f32 %v522_v7, %v526_v6  ;;  %v524_v34 = vmul.f32 %v1168_v25, %v1168_v25 }
 0x243   : > { %v534_v12 = vmax.f32 %v530_v10, 0.0 }
 0x245   : > { %v542_v15 = vadd.f32 1e-05, %v534_v12 }
 0x246   : > { %v503_v17 = vpop.xlane.xlu0 %502  ;;  %v519_v18 = vpop.xlane.xlu2 %518 }
 0x247   : > { %v1159_v19 = vmul.f32 0.03125, %v503_v17  ;;  %948 = vrsqrt.f32 %v542_v15  ;;  %v499_v20 = vpop.xlane.xlu1 %498  ;;  %v523_v21 = vmul.f32 0.03125, %v519_v18  ;;  %vm570_vm14 = vweird.f32 %v542_v15 }
 0x248   : > { %v1166_v23 = vmul.f32 0.03125, %v499_v20 }
 0x249   : > { %v527_v13 = vmul.f32 %v1159_v19, %v1159_v19  ;;  %v539_v62 = vsub.f32 %v1122_v55, %v1159_v19 }
 0x24a   : > { %v525_v30 = vmul.f32 %v1166_v23, %v1166_v23  ;;  %v537_v55 = vsub.f32 %v1124_v57, %v1166_v23 }
 0x24b   : > { %v531_v24 = vsub.f32 %v523_v21, %v527_v13 }
 0x24d   : > { %v535_v26 = vmax.f32 %v531_v24, 0.0  ;;  %v949_v27 = vpop.eup %948 }
 0x24e   : > { %v515_v28 = vpop.xlane.xlu0 %514  ;;  %v565_v29 = vmul.f32 %v949_v27, %v542_v15  ;;  %v513_v33 = vpop.xlane.xlu2 %512  ;;  %vm571_vm13 = vweird.f32 %v949_v27  ;;  %v536_v15 = vsub.f32 %v1116_v52, %v1168_v25  ;;  %v939_v52 = vld [vmem:[%s1222_s5] ss:$0 sm:$0xff] }
 0x24f   : > { %v543_v31 = vadd.f32 1e-05, %v535_v26  ;;  %v521_v32 = vmul.f32 0.03125, %v515_v28  ;;  %v520_v16 = vmul.f32 0.03125, %v513_v33  ;;  %vm572_vm15 = vmor %vm570_vm14, %vm571_vm13 }
 0x250   : > { %v566_v35 = vmul.f32 %v949_v27, %v565_v29 }
 0x251   : > { %950 = vrsqrt.f32 %v543_v31  ;;  %v529_v36 = vsub.f32 %v521_v32, %v525_v30  ;;  %v528_v37 = vsub.f32 %v520_v16, %v524_v34  ;;  %vm580_vm1 = vweird.f32 %v543_v31 }
 0x252   : > { %v567_v38 = vmul.f32 0.5, %v566_v35 }
 0x253   : > { %v533_v39 = vmax.f32 %v529_v36, 0.0  ;;  %v532_v40 = vmax.f32 %v528_v37, 0.0 }
 0x254   : > { %v568_v41 = vsub.f32 1.5, %v567_v38 }
 0x255   : > { %v541_v42 = vadd.f32 1e-05, %v533_v39  ;;  %v540_v44 = vadd.f32 1e-05, %v532_v40 }
 0x256   : > { %v569_v47 = vmul.f32 %v949_v27, %v568_v41 }
 0x257   : > { %v951_v46 = vpop.eup %950  ;;  %952 = vrsqrt.f32 %v541_v42  ;;  %vm560_vm5 = vweird.f32 %v541_v42  ;;  %vm550_vm7 = vweird.f32 %v540_v44 }
 0x258   : > { %v575_v9 = vmul.f32 %v951_v46, %v543_v31  ;;  %954 = vrsqrt.f32 %v540_v44  ;;  %v573_v48 = vsel %vm572_vm15, %v949_v27, %v569_v47  ;;  %vm581_vm0 = vweird.f32 %v951_v46 }
 0x259   : > { %v586_v51 = vmul.f32 %v573_v48, %v538_v49  ;;  %vm582_vm2 = vmor %vm580_vm1, %vm581_vm0 }
 0x25a   : > { %v576_v43 = vmul.f32 %v951_v46, %v575_v9 }
 0x25b   : > { %v591_v63 = vmul.f32 %v937_v53, %v586_v51 }
 0x25c   : > { %v577_v11 = vmul.f32 0.5, %v576_v43 }
 0x25d   : > { %v953_v45 = vpop.eup %952  ;;  %v596_v8 = vadd.f32 %v938_v0, %v591_v63 }
 0x25e   : > { %v955_v54 = vpop.eup %954  ;;  %v578_v56 = vsub.f32 1.5, %v577_v11  ;;  %v555_v58 = vmul.f32 %v953_v45, %v541_v42  ;;  %vm561_vm3 = vweird.f32 %v953_v45 }
 0x25f   : > { %v545_v59 = vmul.f32 %v955_v54, %v540_v44  ;;  %vm551_vm4 = vweird.f32 %v955_v54  ;;  %vm562_vm6 = vmor %vm560_vm5, %vm561_vm3  ;;  %v600_v19 = vmax.f32 %v596_v8, 0.0 }
 0x260   : > { %v579_v60 = vmul.f32 %v951_v46, %v578_v56  ;;  %v556_v61 = vmul.f32 %v953_v45, %v555_v58  ;;  %vm552_vm8 = vmor %vm550_vm7, %vm551_vm4 }
 0x261   : > { %v546_v50 = vmul.f32 %v955_v54, %v545_v59 }
 0x262   : > { %v583_v1 = vsel %vm582_vm2, %v951_v46, %v579_v60  ;;  %v557_v2 = vmul.f32 0.5, %v556_v61 }
 0x263   : > { %v587_v3 = vmul.f32 %v583_v1, %v539_v62  ;;  %v547_v4 = vmul.f32 0.5, %v546_v50 }
 0x264   : > { %v558_v5 = vsub.f32 1.5, %v557_v2 }
 0x265   : > { %v548_v6 = vsub.f32 1.5, %v547_v4  ;;  %v592_v7 = vmul.f32 %v937_v53, %v587_v3 }
 0x266   : > { %v559_v10 = vmul.f32 %v953_v45, %v558_v5 }
 0x267   : > { %v549_v12 = vmul.f32 %v955_v54, %v548_v6  ;;  %v597_v14 = vadd.f32 %v938_v0, %v592_v7 }
 0x268   : > { %v563_v17 = vsel %vm562_vm6, %v953_v45, %v559_v10 }
 0x269   : > { %v553_v18 = vsel %vm552_vm8, %v955_v54, %v549_v12  ;;  %v601_v20 = vmax.f32 %v597_v14, 0.0  ;;  %v585_v21 = vmul.f32 %v563_v17, %v537_v55 }
 0x26a   : > { %v584_v13 = vmul.f32 %v553_v18, %v536_v15 }
 0x26b   : > { %v603_v22 = vpack.c.bf16 %v601_v20, %v600_v19  ;;  %v590_v24 = vmul.f32 %v937_v53, %v585_v21 }
 0x26c   : > { %v589_v26 = vmul.f32 %v937_v53, %v584_v13 }
 0x26d   : > { %684 = vmatmul.bf16.vlgmr.msra.gmra.mxu2 %v603_v22  ;;  %v595_v27 = vadd.f32 %v938_v0, %v590_v24 }
 0x26e   : > { %v594_v57 = vadd.f32 %v938_v0, %v589_v26 }
 0x26f   : > { %v599_v23 = vmax.f32 %v595_v27, 0.0 }
 0x270   : > { %v598_v28 = vmax.f32 %v594_v57, 0.0 }
 0x272   : > { %v602_v29 = vpack.c.bf16 %v599_v23, %v598_v28 }
 0x274   : > { %679 = vmatmul.bf16.vlgmr.msrb.gmra.mxu0 %v602_v29 }
 0x2f0   : > { %v685_v25 = vpop.f32.mrf.mxu2 }
 0x2f1   : > { %v680_v30 = vpop.f32.mrf.mxu0  ;;  %v1191_v31 = vadd.f32 %v939_v52, %v685_v25 }
 0x2f2   : > { %v681_v32 = vadd.f32 %v939_v52, %v680_v30 }
 0x2f3   : > { %v696_v33 = vand.u32 2147483647, %v1191_v31  ;;  %v692_v26 = vmax.f32 %v1191_v31, 0.0 }
 0x2f4   : > { %v694_v34 = vand.u32 2147483647, %v681_v32  ;;  %v690_v50 = vmax.f32 %v681_v32, 0.0 }
 0x2f5   : > { %v700_v16 = vsub.f32 0.0, %v696_v33 }
 0x2f6   : > { %v698_v35 = vsub.f32 0.0, %v694_v34 }
 0x2f7   : > { %v706_v36 = vmul.f32 1.442695, %v700_v16 }
 0x2f8   : > { %v702_v37 = vmul.f32 1.442695, %v698_v35  ;;  %v687_v38 = vpop.f32.mrf.mxu2 }
 0x2f9   : > { %v682_v39 = vpop.f32.mrf.mxu0  ;;  %v1194_v40 = vadd.f32 %v939_v52, %v687_v38 }
 0x2fa   : > { %956 = vpow2.f32 %v702_v37  ;;  %v683_v41 = vadd.f32 %v939_v52, %v682_v39 }
 0x2fb   : > { %958 = vpow2.f32 %v706_v36  ;;  %v697_v42 = vand.u32 2147483647, %v1194_v40  ;;  %v693_v28 = vmax.f32 %v1194_v40, 0.0 }
 0x2fc   : > { %v695_v44 = vand.u32 2147483647, %v683_v41  ;;  %v691_v24 = vmax.f32 %v683_v41, 0.0 }
 0x2fd   : > { %v701_v46 = vsub.f32 0.0, %v697_v42 }
 0x2fe   : > { %v699_v47 = vsub.f32 0.0, %v695_v44 }
 0x2ff   : > { %v708_v9 = vmul.f32 1.442695, %v701_v46 }
 0x300   : > { %v957_v43 = vpop.eup %956  ;;  %v704_v48 = vmul.f32 1.442695, %v699_v47 }
 0x301   : > { %v959_v49 = vpop.eup %958  ;;  %v710_v11 = vadd.f32 1.0, %v957_v43  ;;  %960 = vpow2.f32 %v708_v9  ;;  %v713_v45 = vmul.f32 -0.5, %v957_v43  ;;  %v716_v56 = vand.u32 2147483647, %v957_v43 }
 0x302   : > { %v728_v51 = vadd.f32 1.0, %v959_v49  ;;  %v731_v63 = vmul.f32 -0.5, %v959_v49  ;;  %v734_v8 = vand.u32 2147483647, %v959_v49 }
 0x303   : > { %962 = vlog2.f32 %v710_v11  ;;  %v714_v53 = vadd.f32 1.0, %v713_v45  ;;  %vm717_vm9 = vcmp.lt.f32.partialorder %v716_v56, 0.0004427343 }
 0x304   : > { %964 = vpow2.f32 %v704_v48  ;;  %v732_v6 = vadd.f32 1.0, %v731_v63  ;;  %vm735_vm11 = vcmp.lt.f32.partialorder %v734_v8, 0.0004427343 }
 0x305   : > { %966 = vlog2.f32 %v728_v51  ;;  %v715_v62 = vmul.f32 %v957_v43, %v714_v53 }
 0x306   : > { %v733_v19 = vmul.f32 %v959_v49, %v732_v6 }
 0x307   : > { %v961_v54 = vpop.eup %960 }
 0x308   : > { %v737_v58 = vadd.f32 1.0, %v961_v54  ;;  %v740_v3 = vmul.f32 -0.5, %v961_v54  ;;  %v743_v15 = vand.u32 2147483647, %v961_v54 }
 0x309   : > { %v963_v59 = vpop.eup %962 }
 0x30a   : > { %v965_v60 = vpop.eup %964  ;;  %v712_v61 = vmul.f32 0.6931472, %v963_v59  ;;  %968 = vlog2.f32 %v737_v58  ;;  %v741_v55 = vadd.f32 1.0, %v740_v3  ;;  %vm744_vm13 = vcmp.lt.f32.partialorder %v743_v15, 0.0004427343 }
 0x30b   : > { %v719_v0 = vadd.f32 1.0, %v965_v60  ;;  %v722_v2 = vmul.f32 -0.5, %v965_v60  ;;  %v967_v5 = vpop.eup %966  ;;  %v725_v14 = vand.u32 2147483647, %v965_v60 }
 0x30c   : > { %v718_v1 = vsel %vm717_vm9, %v715_v62, %v712_v61  ;;  %v730_v12 = vmul.f32 0.6931472, %v967_v5  ;;  %v742_v13 = vmul.f32 %v961_v54, %v741_v55 }
 0x30d   : > { %v746_v4 = vadd.f32 %v718_v1, %v690_v50  ;;  %970 = vlog2.f32 %v719_v0  ;;  %v723_v10 = vadd.f32 1.0, %v722_v2  ;;  %vm726_vm12 = vcmp.lt.f32.partialorder %v725_v14, 0.0004427343 }
 0x30e   : > { %v736_v22 = vsel %vm735_vm11, %v733_v19, %v730_v12 }
 0x30f   : > { %751 = vst.msk [vmem:[%s1202_s12] sm:$0xff] %vm750_vm10, %v746_v4  ;;  %v724_v21 = vmul.f32 %v965_v60, %v723_v10  ;;  %v748_v29 = vadd.f32 %v736_v22, %v692_v26 }
 0x310   : > { %v969_v7 = vpop.eup %968 }
 0x311   : > { %v739_v17 = vmul.f32 0.6931472, %v969_v7  ;;  %753 = vst.msk [vmem:[%s1202_s12 + $0x10] sm:$0xff] %vm750_vm10, %v748_v29 }
 0x313   : > { %v971_v18 = vpop.eup %970  ;;  %v745_v57 = vsel %vm744_vm13, %v742_v13, %v739_v17 }
 0x314   : > { %v721_v20 = vmul.f32 0.6931472, %v971_v18  ;;  %v749_v52 = vadd.f32 %v745_v57, %v693_v28 }
 0x316   : > { %v727_v27 = vsel %vm726_vm12, %v724_v21, %v721_v20  ;;  %754 = vst.msk [vmem:[%s1202_s12 + $0x18] sm:$0xff] %vm750_vm10, %v749_v52 }
 0x317   : > { %v747_v23 = vadd.f32 %v727_v27, %v691_v24 }
 0x319   : > { %752 = vst.msk [vmem:[%s1202_s12 + $0x8] sm:$0xff] %vm750_vm10, %v747_v23 }
 0x31a PF: > { %s16_s21 = sadd.s32 1, %s978_s21  }
 0x31b   : > { %p13_p4 = scmp.ge.s32.totalorder %s16_s21, 4  }
 0x31d   :  { %15 = sbr.rel (!%p13_p4) target bundleno = 1 (0x1), region = 74 }

// kernel: tpu_custom_call.1
= control target key start
LH: loop header
LB: loop body
LE: loop exit
PB: predicated region body
PF: predicated region fallthrough
CT: control target
= control target key end

     0   :  { %s1015_s21 = smov 0   ;;  %s1217_s0 = inlined_call_operand.vmem [shape: f32[64,16], index: 0, kind: input, shape index: {}]   ;;  %s1218_s1 = inlined_call_operand.vmem [shape: bf16[16,128], index: 1, kind: input, shape index: {}]   ;;  %s1219_s2 = inlined_call_operand.vmem [shape: bf16[128,128], index: 2, kind: input, shape index: {}]   ;;  %s1220_s3 = inlined_call_operand.vmem [shape: bf16[128,8], index: 3, kind: input, shape index: {}]   ;;  %s1221_s4 = inlined_call_operand.vmem [shape: f32[8,128], index: 4, kind: input, shape index: {}]   ;;  %s1222_s5 = inlined_call_operand.vmem [shape: f32[1,8], index: 5, kind: input, shape index: {}]   ;;  %s1223_s6 = inlined_call_operand.vmem [shape: f32[64,8], index: 6, kind: output, shape index: {}]  }
   0x1 LB: > { %s811_s22 = sadd.s32 4294967295, %s978_s21   ;;  %p815_p0 = scmp.ge.s32.totalorder %s978_s21, 1  ;;  %s978_s21 = sphi %s1015_s21, %s16_s21  }
   0x2   : > { %p213_p1 = scmp.lt.s32.totalorder %s978_s21, 3 }
   0x4   : > { %p214_p2 = pnand %p815_p0, %p213_p1 }
   0x5   : > { %s816_s25 = sshll.u32 (!%p214_p2), %s811_s22, 2 }
   0x6   : > { %217 = sbr.rel (%p214_p2) target bundleno = 794 (0x31a), region = 44  ;;  %p244_p3 = scmp.lt.s32.totalorder (!%p214_p2), %s816_s25, 7 }
   0xb   : > { %v892_v0 = vld [vmem:[%s1218_s1] sm:$0xff]  ;;  %s1225_s25 = smov (!%p244_p3, %s816_s25), 7  ;;  %vm278_vm0 = vcmask 130048   ;;  %v900_v20 = vld [vmem:[%s1219_s2 + $0x38] sm:$0xff]  ;;  %v899_v21 = vld [vmem:[%s1219_s2 + $0x30] sm:$0xff] }
   0xc   : > { %292 = vmatpush.bf16.msra.mxu0 %v892_v0  ;;  %s817_s26 = sshll.u32 %s1225_s25, 3  ;;  %v933_v7 = vld [vmem:[%s1221_s4] ss:$0 sm:$0xff]  ;;  %909 = vmatpush.bf16.msra.mxu3 %v900_v20  ;;  %v898_v22 = vld [vmem:[%s1219_s2 + $0x28] sm:$0xff]  ;;  %v896_v24 = vld [vmem:[%s1219_s2 + $0x18] sm:$0xff] }
   0xd   : > { %s247_s29 = scalar_lea.vmem %s1217_s0, %s817_s26  ;;  %477 = vmatpush.bf16.msra.mxu1 %v900_v20  ;;  %v897_v23 = vld [vmem:[%s1219_s2 + $0x20] sm:$0xff]  ;;  %v895_v31 = vld [vmem:[%s1219_s2 + $0x10] sm:$0xff]  ;;  %v894_v34 = vld [vmem:[%s1219_s2 + $0x8] sm:$0xff]  ;;  %s1202_s12 = scalar_lea.vmem %s1223_s6, %s817_s26 }
   0xe   : > { %v263_v1 = vld [vmem:[%s247_s29] sm:$0xff]  ;;  %v264_v2 = vld [vmem:[%s247_s29 + $0x8] sm:$0xff]  ;;  %v265_v4 = vld [vmem:[%s247_s29 + $0x10] sm:$0xff] }
   0xf   : > { %v267_v3 = vpack.c.bf16 %v264_v2, %v263_v1  ;;  %v266_v5 = vld [vmem:[%s247_s29 + $0x18] sm:$0xff]  ;;  %v893_v39 = vld [vmem:[%s1219_s2] sm:$0xff] }
  0x10   : > { %v268_v6 = vpack.c.bf16 %v266_v5, %v265_v4  ;;  %910 = vmatpush.bf16.msra.mxu3 %v899_v21 }
  0x11   : > { %824 = vmatmul.msk.bf16.vlgmr.msra.gmra.mxu0 %vm278_vm0, %v267_v3  ;;  %478 = vmatpush.bf16.msra.mxu1 %v899_v21 }
  0x14   : > { %911 = vmatpush.bf16.msra.mxu3 %v898_v22 }
  0x15   : > { %479 = vmatpush.bf16.msra.mxu1 %v898_v22 }
  0x18   : > { %912 = vmatpush.bf16.msra.mxu3 %v897_v23 }
  0x19   : > { %480 = vmatpush.bf16.msra.mxu1 %v897_v23 }
  0x1c   : > { %913 = vmatpush.bf16.msra.mxu3 %v896_v24 }
  0x1d   : > { %481 = vmatpush.bf16.msra.mxu1 %v896_v24 }
  0x20   : > { %914 = vmatpush.bf16.msra.mxu3 %v895_v31 }
  0x21   : > { %825 = vmatmul.msk.bf16.gmra.mxu0 %vm278_vm0, %v268_v6  ;;  %482 = vmatpush.bf16.msra.mxu1 %v895_v31 }
  0x24   : > { %915 = vmatpush.bf16.msra.mxu3 %v894_v34 }
  0x25   : > { %483 = vmatpush.bf16.msra.mxu1 %v894_v34 }
  0x28   : > { %916 = vmatpush.bf16.msra.mxu3 %v893_v39 }
  0x29   : > { %484 = vmatpush.bf16.msra.mxu1 %v893_v39 }
  0x8e   : > { %v294_v8 = vpop.f32.mrf.mxu0 }
  0x8f   : > { %v1037_v9 = vadd.f32 %v933_v7, %v294_v8 }
  0x91   : > { %304 = vadd.xlane.f32.xlu2 %v1037_v9  ;;  %v316_v18 = vmul.f32 %v1037_v9, %v1037_v9 }
  0x96   : > { %v296_v10 = vpop.f32.mrf.mxu0 }
  0x97   : > { %v1040_v11 = vadd.f32 %v933_v7, %v296_v10 }
  0x99   : > { %306 = vadd.xlane.f32.xlu2 %v1040_v11  ;;  %v317_v19 = vmul.f32 %v1040_v11, %v1040_v11 }
  0x9e   : > { %v299_v12 = vpop.f32.mrf.mxu0 }
  0x9f   : > { %v1043_v13 = vadd.f32 %v933_v7, %v299_v12  ;;  %v934_v12 = vld [vmem:[%s1221_s4 + $0x1] ss:$0 sm:$0xff] }
  0xa1   : > { %308 = vadd.xlane.f32.xlu0 %v1043_v13  ;;  %v318_v14 = vmul.f32 %v1043_v13, %v1043_v13 }
  0xa3   : > { %324 = vadd.xlane.f32.xlu1 %v318_v14 }
  0xa6   : > { %v301_v15 = vpop.f32.mrf.mxu0 }
  0xa7   : > { %v1048_v16 = vadd.f32 %v933_v7, %v301_v15 }
  0xa9   : > { %310 = vadd.xlane.f32.xlu0 %v1048_v16  ;;  %v319_v17 = vmul.f32 %v1048_v16, %v1048_v16 }
  0xab   : > { %326 = vadd.xlane.f32.xlu1 %v319_v17 }
  0xb1   : > { %320 = vadd.xlane.f32.xlu0 %v316_v18 }
  0xb3   : > { %322 = vadd.xlane.f32.xlu1 %v317_v19 }
 0x104   : > { %v305_v27 = vpop.xlane.xlu2 %304 }
 0x105   : > { %v1089_v43 = vmul.f32 0.03125, %v305_v27 }
 0x107   : > { %v332_v49 = vmul.f32 %v1089_v43, %v1089_v43 }
 0x10c   : > { %v307_v41 = vpop.xlane.xlu2 %306 }
 0x10d   : > { %v1091_v45 = vmul.f32 0.03125, %v307_v41 }
 0x10f   : > { %v333_v54 = vmul.f32 %v1091_v45, %v1091_v45 }
 0x114   : > { %v309_v25 = vpop.xlane.xlu0 %308 }
 0x115   : > { %v1072_v26 = vmul.f32 0.03125, %v309_v25 }
 0x116   : > { %v325_v28 = vpop.xlane.xlu1 %324 }
 0x117   : > { %v334_v29 = vmul.f32 %v1072_v26, %v1072_v26  ;;  %v330_v30 = vmul.f32 0.03125, %v325_v28  ;;  %v346_v5 = vsub.f32 %v1043_v13, %v1072_v26  ;;  %v935_v13 = vld [vmem:[%s1221_s4 + $0x2] ss:$0 sm:$0xff] }
 0x119   : > { %v338_v32 = vsub.f32 %v330_v30, %v334_v29 }
 0x11b   : > { %v342_v33 = vmax.f32 %v338_v32, 0.0 }
 0x11c   : > { %v311_v35 = vpop.xlane.xlu0 %310 }
 0x11d   : > { %v350_v36 = vadd.f32 1e-05, %v342_v33  ;;  %v1082_v37 = vmul.f32 0.03125, %v311_v35  ;;  %v344_v33 = vsub.f32 %v1037_v9, %v1089_v43 }
 0x11e   : > { %v327_v38 = vpop.xlane.xlu1 %326 }
 0x11f   : > { %940 = vrsqrt.f32 %v350_v36  ;;  %v335_v40 = vmul.f32 %v1082_v37, %v1082_v37  ;;  %v331_v42 = vmul.f32 0.03125, %v327_v38  ;;  %vm378_vm2 = vweird.f32 %v350_v36 }
 0x120   : > { %v347_v22 = vsub.f32 %v1048_v16, %v1082_v37 }
 0x121   : > { %v339_v44 = vsub.f32 %v331_v42, %v335_v40 }
 0x123   : > { %v343_v46 = vmax.f32 %v339_v44, 0.0 }
 0x124   : > { %v321_v47 = vpop.xlane.xlu0 %320 }
 0x125   : > { %v941_v48 = vpop.eup %940  ;;  %v328_v50 = vmul.f32 0.03125, %v321_v47  ;;  %v351_v52 = vadd.f32 1e-05, %v343_v46 }
 0x126   : > { %v373_v51 = vmul.f32 %v941_v48, %v350_v36  ;;  %v323_v53 = vpop.xlane.xlu1 %322  ;;  %vm379_vm1 = vweird.f32 %v941_v48  ;;  %v345_v36 = vsub.f32 %v1040_v11, %v1091_v45  ;;  %v936_v11 = vld [vmem:[%s1221_s4 + $0x3] ss:$0 sm:$0xff] }
 0x127   : > { %v336_v55 = vsub.f32 %v328_v50, %v332_v49  ;;  %v329_v56 = vmul.f32 0.03125, %v323_v53  ;;  %942 = vrsqrt.f32 %v351_v52  ;;  %vm380_vm3 = vmor %vm378_vm2, %vm379_vm1  ;;  %vm388_vm5 = vweird.f32 %v351_v52 }
 0x128   : > { %v374_v57 = vmul.f32 %v941_v48, %v373_v51 }
 0x129   : > { %v340_v58 = vmax.f32 %v336_v55, 0.0  ;;  %v337_v59 = vsub.f32 %v329_v56, %v333_v54 }
 0x12a   : > { %v375_v60 = vmul.f32 0.5, %v374_v57 }
 0x12b   : > { %v348_v61 = vadd.f32 1e-05, %v340_v58  ;;  %v341_v62 = vmax.f32 %v337_v59, 0.0 }
 0x12c   : > { %v376_v63 = vsub.f32 1.5, %v375_v60 }
 0x12d   : > { %944 = vrsqrt.f32 %v348_v61  ;;  %v349_v0 = vadd.f32 1e-05, %v341_v62  ;;  %v943_v1 = vpop.eup %942  ;;  %vm358_vm8 = vweird.f32 %v348_v61  ;;  %v907_v62 = vld [vmem:[%s1220_s3 + $0x30] sm:$0xff] }
 0x12e   : > { %v377_v2 = vmul.f32 %v941_v48, %v376_v63  ;;  %v383_v3 = vmul.f32 %v943_v1, %v351_v52  ;;  %vm389_vm4 = vweird.f32 %v943_v1  ;;  %v906_v63 = vld [vmem:[%s1220_s3 + $0x28] sm:$0xff] }
 0x12f   : > { %946 = vrsqrt.f32 %v349_v0  ;;  %vm390_vm6 = vmor %vm388_vm5, %vm389_vm4  ;;  %vm368_vm11 = vweird.f32 %v349_v0 }
 0x130   : > { %v381_v4 = vsel %vm380_vm3, %v941_v48, %v377_v2  ;;  %v384_v6 = vmul.f32 %v943_v1, %v383_v3  ;;  %v904_v2 = vld [vmem:[%s1220_s3 + $0x18] sm:$0xff] }
 0x131   : > { %v394_v10 = vmul.f32 %v381_v4, %v346_v5 }
 0x132   : > { %v385_v8 = vmul.f32 0.5, %v384_v6 }
 0x133   : > { %v945_v7 = vpop.eup %944  ;;  %v399_v21 = vmul.f32 %v934_v12, %v394_v10 }
 0x134   : > { %v353_v14 = vmul.f32 %v945_v7, %v348_v61  ;;  %v386_v17 = vsub.f32 1.5, %v385_v8  ;;  %vm359_vm7 = vweird.f32 %v945_v7  ;;  %v908_v61 = vld [vmem:[%s1220_s3 + $0x38] sm:$0xff]  ;;  %v903_v8 = vld [vmem:[%s1220_s3 + $0x10] sm:$0xff] }
 0x135   : > { %v947_v15 = vpop.eup %946  ;;  %v404_v29 = vadd.f32 %v935_v13, %v399_v21  ;;  %vm360_vm10 = vmor %vm358_vm8, %vm359_vm7  ;;  %917 = vmatpush.bf16.msra.mxu2 %v908_v61  ;;  %671 = vmatpush.bf16.msrb.mxu0 %v908_v61 }
 0x136   : > { %v354_v18 = vmul.f32 %v945_v7, %v353_v14  ;;  %v363_v19 = vmul.f32 %v947_v15, %v349_v0  ;;  %v387_v20 = vmul.f32 %v943_v1, %v386_v17  ;;  %vm369_vm9 = vweird.f32 %v947_v15  ;;  %v905_v0 = vld [vmem:[%s1220_s3 + $0x20] sm:$0xff]  ;;  %v902_v14 = vld [vmem:[%s1220_s3 + $0x8] sm:$0xff] }
 0x137   : > { %vm370_vm12 = vmor %vm368_vm11, %vm369_vm9  ;;  %v408_v38 = vmax.f32 %v404_v29, 0.0 }
 0x138   : > { %v355_v23 = vmul.f32 0.5, %v354_v18  ;;  %v364_v24 = vmul.f32 %v947_v15, %v363_v19  ;;  %v391_v25 = vsel %vm390_vm6, %v943_v1, %v387_v20 }
 0x139   : > { %v395_v28 = vmul.f32 %v391_v25, %v347_v22  ;;  %918 = vmatpush.bf16.msra.mxu2 %v907_v62  ;;  %672 = vmatpush.bf16.msrb.mxu0 %v907_v62  ;;  %v901_v22 = vld [vmem:[%s1220_s3] sm:$0xff] }
 0x13a   : > { %v356_v26 = vsub.f32 1.5, %v355_v23  ;;  %v365_v27 = vmul.f32 0.5, %v364_v24 }
 0x13b   : > { %v400_v32 = vmul.f32 %v934_v12, %v395_v28 }
 0x13c   : > { %v357_v30 = vmul.f32 %v945_v7, %v356_v26  ;;  %v366_v31 = vsub.f32 1.5, %v365_v27 }
 0x13d   : > { %v405_v16 = vadd.f32 %v935_v13, %v400_v32  ;;  %919 = vmatpush.bf16.msra.mxu2 %v906_v63  ;;  %673 = vmatpush.bf16.msrb.mxu0 %v906_v63 }
 0x13e   : > { %v367_v34 = vmul.f32 %v947_v15, %v366_v31  ;;  %v361_v35 = vsel %vm360_vm10, %v945_v7, %v357_v30  ;;  %vm750_vm10 = vcmask 64512  }
 0x13f   : > { %v392_v37 = vmul.f32 %v361_v35, %v344_v33  ;;  %v409_v39 = vmax.f32 %v405_v16, 0.0 }
 0x140   : > { %v371_v40 = vsel %vm370_vm12, %v947_v15, %v367_v34 }
 0x141   : > { %v393_v41 = vmul.f32 %v371_v40, %v345_v36  ;;  %v397_v42 = vmul.f32 %v934_v12, %v392_v37  ;;  %v411_v44 = vpack.c.bf16 %v409_v39, %v408_v38  ;;  %920 = vmatpush.bf16.msra.mxu2 %v905_v0  ;;  %674 = vmatpush.bf16.msrb.mxu0 %v905_v0  ;;  %v938_v0 = vld [vmem:[%s1221_s4 + $0x5] ss:$0 sm:$0xff] }
 0x143   : > { %v398_v46 = vmul.f32 %v934_v12, %v393_v41  ;;  %v402_v47 = vadd.f32 %v935_v13, %v397_v42  ;;  %490 = vmatmul.bf16.vlgmr.msra.gmra.mxu3 %v411_v44 }
 0x145   : > { %v403_v9 = vadd.f32 %v935_v13, %v398_v46  ;;  %v406_v43 = vmax.f32 %v402_v47, 0.0  ;;  %921 = vmatpush.bf16.msra.mxu2 %v904_v2  ;;  %675 = vmatpush.bf16.msrb.mxu0 %v904_v2 }
 0x147   : > { %v407_v48 = vmax.f32 %v403_v9, 0.0 }
 0x149   : > { %v410_v49 = vpack.c.bf16 %v407_v48, %v406_v43  ;;  %922 = vmatpush.bf16.msra.mxu2 %v903_v8  ;;  %676 = vmatpush.bf16.msrb.mxu0 %v903_v8 }
 0x14b   : > { %485 = vmatmul.bf16.vlgmr.msra.gmra.mxu1 %v410_v49 }
 0x14d   : > { %923 = vmatpush.bf16.msra.mxu2 %v902_v14  ;;  %677 = vmatpush.bf16.msrb.mxu0 %v902_v14 }
 0x151   : > { %924 = vmatpush.bf16.msra.mxu2 %v901_v22  ;;  %678 = vmatpush.bf16.msrb.mxu0 %v901_v22 }
 0x1c6   : > { %v491_v45 = vpop.f32.mrf.mxu3 }
 0x1c7   : > { %v1114_v50 = vadd.f32 %v936_v11, %v491_v45 }
 0x1c8   : > { %v486_v51 = vpop.f32.mrf.mxu1 }
 0x1c9   : > { %v1116_v52 = vadd.f32 %v936_v11, %v486_v51  ;;  %500 = vadd.xlane.f32.xlu2 %v1114_v50  ;;  %v510_v53 = vmul.f32 %v1114_v50, %v1114_v50 }
 0x1cb   : > { %496 = vadd.xlane.f32.xlu0 %v1116_v52  ;;  %516 = vadd.xlane.f32.xlu1 %v510_v53  ;;  %v508_v60 = vmul.f32 %v1116_v52, %v1116_v52  ;;  %v937_v53 = vld [vmem:[%s1221_s4 + $0x4] ss:$0 sm:$0xff] }
 0x1ce   : > { %v493_v54 = vpop.f32.mrf.mxu3 }
 0x1cf   : > { %v1122_v55 = vadd.f32 %v936_v11, %v493_v54 }
 0x1d0   : > { %v488_v56 = vpop.f32.mrf.mxu1 }
 0x1d1   : > { %v1124_v57 = vadd.f32 %v936_v11, %v488_v56  ;;  %v511_v58 = vmul.f32 %v1122_v55, %v1122_v55 }
 0x1d3   : > { %502 = vadd.xlane.f32.xlu0 %v1122_v55  ;;  %518 = vadd.xlane.f32.xlu2 %v511_v58  ;;  %v509_v59 = vmul.f32 %v1124_v57, %v1124_v57 }
 0x1d4   : > { %498 = vadd.xlane.f32.xlu1 %v1124_v57 }
 0x1db   : > { %514 = vadd.xlane.f32.xlu0 %v509_v59  ;;  %512 = vadd.xlane.f32.xlu2 %v508_v60 }
 0x23c   : > { %v501_v1 = vpop.xlane.xlu2 %500 }
 0x23d   : > { %v1149_v3 = vmul.f32 0.03125, %v501_v1 }
 0x23e   : > { %v497_v4 = vpop.xlane.xlu0 %496  ;;  %v517_v5 = vpop.xlane.xlu1 %516 }
 0x23f   : > { %v526_v6 = vmul.f32 %v1149_v3, %v1149_v3  ;;  %v522_v7 = vmul.f32 0.03125, %v517_v5  ;;  %v1168_v25 = vmul.f32 0.03125, %v497_v4  ;;  %v538_v49 = vsub.f32 %v1114_v50, %v1149_v3 }
 0x241   : > { %v530_v10 = vsub.f32 %v522_v7, %v526_v6  ;;  %v524_v34 = vmul.f32 %v1168_v25, %v1168_v25 }
 0x243   : > { %v534_v12 = vmax.f32 %v530_v10, 0.0 }
 0x245   : > { %v542_v15 = vadd.f32 1e-05, %v534_v12 }
 0x246   : > { %v503_v17 = vpop.xlane.xlu0 %502  ;;  %v519_v18 = vpop.xlane.xlu2 %518 }
 0x247   : > { %v1159_v19 = vmul.f32 0.03125, %v503_v17  ;;  %948 = vrsqrt.f32 %v542_v15  ;;  %v499_v20 = vpop.xlane.xlu1 %498  ;;  %v523_v21 = vmul.f32 0.03125, %v519_v18  ;;  %vm570_vm14 = vweird.f32 %v542_v15 }
 0x248   : > { %v1166_v23 = vmul.f32 0.03125, %v499_v20 }
 0x249   : > { %v527_v13 = vmul.f32 %v1159_v19, %v1159_v19  ;;  %v539_v62 = vsub.f32 %v1122_v55, %v1159_v19 }
 0x24a   : > { %v525_v30 = vmul.f32 %v1166_v23, %v1166_v23  ;;  %v537_v55 = vsub.f32 %v1124_v57, %v1166_v23 }
 0x24b   : > { %v531_v24 = vsub.f32 %v523_v21, %v527_v13 }
 0x24d   : > { %v535_v26 = vmax.f32 %v531_v24, 0.0  ;;  %v949_v27 = vpop.eup %948 }
 0x24e   : > { %v515_v28 = vpop.xlane.xlu0 %514  ;;  %v565_v29 = vmul.f32 %v949_v27, %v542_v15  ;;  %v513_v33 = vpop.xlane.xlu2 %512  ;;  %vm571_vm13 = vweird.f32 %v949_v27  ;;  %v536_v15 = vsub.f32 %v1116_v52, %v1168_v25  ;;  %v939_v52 = vld [vmem:[%s1222_s5] ss:$0 sm:$0xff] }
 0x24f   : > { %v543_v31 = vadd.f32 1e-05, %v535_v26  ;;  %v521_v32 = vmul.f32 0.03125, %v515_v28  ;;  %v520_v16 = vmul.f32 0.03125, %v513_v33  ;;  %vm572_vm15 = vmor %vm570_vm14, %vm571_vm13 }
 0x250   : > { %v566_v35 = vmul.f32 %v949_v27, %v565_v29 }
 0x251   : > { %950 = vrsqrt.f32 %v543_v31  ;;  %v529_v36 = vsub.f32 %v521_v32, %v525_v30  ;;  %v528_v37 = vsub.f32 %v520_v16, %v524_v34  ;;  %vm580_vm1 = vweird.f32 %v543_v31 }
 0x252   : > { %v567_v38 = vmul.f32 0.5, %v566_v35 }
 0x253   : > { %v533_v39 = vmax.f32 %v529_v36, 0.0  ;;  %v532_v40 = vmax.f32 %v528_v37, 0.0 }
 0x254   : > { %v568_v41 = vsub.f32 1.5, %v567_v38 }
 0x255   : > { %v541_v42 = vadd.f32 1e-05, %v533_v39  ;;  %v540_v44 = vadd.f32 1e-05, %v532_v40 }
 0x256   : > { %v569_v47 = vmul.f32 %v949_v27, %v568_v41 }
 0x257   : > { %v951_v46 = vpop.eup %950  ;;  %952 = vrsqrt.f32 %v541_v42  ;;  %vm560_vm5 = vweird.f32 %v541_v42  ;;  %vm550_vm7 = vweird.f32 %v540_v44 }
 0x258   : > { %v575_v9 = vmul.f32 %v951_v46, %v543_v31  ;;  %954 = vrsqrt.f32 %v540_v44  ;;  %v573_v48 = vsel %vm572_vm15, %v949_v27, %v569_v47  ;;  %vm581_vm0 = vweird.f32 %v951_v46 }
 0x259   : > { %v586_v51 = vmul.f32 %v573_v48, %v538_v49  ;;  %vm582_vm2 = vmor %vm580_vm1, %vm581_vm0 }
 0x25a   : > { %v576_v43 = vmul.f32 %v951_v46, %v575_v9 }
 0x25b   : > { %v591_v63 = vmul.f32 %v937_v53, %v586_v51 }
 0x25c   : > { %v577_v11 = vmul.f32 0.5, %v576_v43 }
 0x25d   : > { %v953_v45 = vpop.eup %952  ;;  %v596_v8 = vadd.f32 %v938_v0, %v591_v63 }
 0x25e   : > { %v955_v54 = vpop.eup %954  ;;  %v578_v56 = vsub.f32 1.5, %v577_v11  ;;  %v555_v58 = vmul.f32 %v953_v45, %v541_v42  ;;  %vm561_vm3 = vweird.f32 %v953_v45 }
 0x25f   : > { %v545_v59 = vmul.f32 %v955_v54, %v540_v44  ;;  %vm551_vm4 = vweird.f32 %v955_v54  ;;  %vm562_vm6 = vmor %vm560_vm5, %vm561_vm3  ;;  %v600_v19 = vmax.f32 %v596_v8, 0.0 }
 0x260   : > { %v579_v60 = vmul.f32 %v951_v46, %v578_v56  ;;  %v556_v61 = vmul.f32 %v953_v45, %v555_v58  ;;  %vm552_vm8 = vmor %vm550_vm7, %vm551_vm4 }
 0x261   : > { %v546_v50 = vmul.f32 %v955_v54, %v545_v59 }
 0x262   : > { %v583_v1 = vsel %vm582_vm2, %v951_v46, %v579_v60  ;;  %v557_v2 = vmul.f32 0.5, %v556_v61 }
 0x263   : > { %v587_v3 = vmul.f32 %v583_v1, %v539_v62  ;;  %v547_v4 = vmul.f32 0.5, %v546_v50 }
 0x264   : > { %v558_v5 = vsub.f32 1.5, %v557_v2 }
 0x265   : > { %v548_v6 = vsub.f32 1.5, %v547_v4  ;;  %v592_v7 = vmul.f32 %v937_v53, %v587_v3 }
 0x266   : > { %v559_v10 = vmul.f32 %v953_v45, %v558_v5 }
 0x267   : > { %v549_v12 = vmul.f32 %v955_v54, %v548_v6  ;;  %v597_v14 = vadd.f32 %v938_v0, %v592_v7 }
 0x268   : > { %v563_v17 = vsel %vm562_vm6, %v953_v45, %v559_v10 }
 0x269   : > { %v553_v18 = vsel %vm552_vm8, %v955_v54, %v549_v12  ;;  %v601_v20 = vmax.f32 %v597_v14, 0.0  ;;  %v585_v21 = vmul.f32 %v563_v17, %v537_v55 }
 0x26a   : > { %v584_v13 = vmul.f32 %v553_v18, %v536_v15 }
 0x26b   : > { %v603_v22 = vpack.c.bf16 %v601_v20, %v600_v19  ;;  %v590_v24 = vmul.f32 %v937_v53, %v585_v21 }
 0x26c   : > { %v589_v26 = vmul.f32 %v937_v53, %v584_v13 }
 0x26d   : > { %684 = vmatmul.bf16.vlgmr.msra.gmra.mxu2 %v603_v22  ;;  %v595_v27 = vadd.f32 %v938_v0, %v590_v24 }
 0x26e   : > { %v594_v57 = vadd.f32 %v938_v0, %v589_v26 }
 0x26f   : > { %v599_v23 = vmax.f32 %v595_v27, 0.0 }
 0x270   : > { %v598_v28 = vmax.f32 %v594_v57, 0.0 }
 0x272   : > { %v602_v29 = vpack.c.bf16 %v599_v23, %v598_v28 }
 0x274   : > { %679 = vmatmul.bf16.vlgmr.msrb.gmra.mxu0 %v602_v29 }
 0x2f0   : > { %v685_v25 = vpop.f32.mrf.mxu2 }
 0x2f1   : > { %v680_v30 = vpop.f32.mrf.mxu0  ;;  %v1191_v31 = vadd.f32 %v939_v52, %v685_v25 }
 0x2f2   : > { %v681_v32 = vadd.f32 %v939_v52, %v680_v30 }
 0x2f3   : > { %v696_v33 = vand.u32 2147483647, %v1191_v31  ;;  %v692_v26 = vmax.f32 %v1191_v31, 0.0 }
 0x2f4   : > { %v694_v34 = vand.u32 2147483647, %v681_v32  ;;  %v690_v50 = vmax.f32 %v681_v32, 0.0 }
 0x2f5   : > { %v700_v16 = vsub.f32 0.0, %v696_v33 }
 0x2f6   : > { %v698_v35 = vsub.f32 0.0, %v694_v34 }
 0x2f7   : > { %v706_v36 = vmul.f32 1.442695, %v700_v16 }
 0x2f8   : > { %v702_v37 = vmul.f32 1.442695, %v698_v35  ;;  %v687_v38 = vpop.f32.mrf.mxu2 }
 0x2f9   : > { %v682_v39 = vpop.f32.mrf.mxu0  ;;  %v1194_v40 = vadd.f32 %v939_v52, %v687_v38 }
 0x2fa   : > { %956 = vpow2.f32 %v702_v37  ;;  %v683_v41 = vadd.f32 %v939_v52, %v682_v39 }
 0x2fb   : > { %958 = vpow2.f32 %v706_v36  ;;  %v697_v42 = vand.u32 2147483647, %v1194_v40  ;;  %v693_v28 = vmax.f32 %v1194_v40, 0.0 }
 0x2fc   : > { %v695_v44 = vand.u32 2147483647, %v683_v41  ;;  %v691_v24 = vmax.f32 %v683_v41, 0.0 }
 0x2fd   : > { %v701_v46 = vsub.f32 0.0, %v697_v42 }
 0x2fe   : > { %v699_v47 = vsub.f32 0.0, %v695_v44 }
 0x2ff   : > { %v708_v9 = vmul.f32 1.442695, %v701_v46 }
 0x300   : > { %v957_v43 = vpop.eup %956  ;;  %v704_v48 = vmul.f32 1.442695, %v699_v47 }
 0x301   : > { %v959_v49 = vpop.eup %958  ;;  %v710_v11 = vadd.f32 1.0, %v957_v43  ;;  %960 = vpow2.f32 %v708_v9  ;;  %v713_v45 = vmul.f32 -0.5, %v957_v43  ;;  %v716_v56 = vand.u32 2147483647, %v957_v43 }
 0x302   : > { %v728_v51 = vadd.f32 1.0, %v959_v49  ;;  %v731_v63 = vmul.f32 -0.5, %v959_v49  ;;  %v734_v8 = vand.u32 2147483647, %v959_v49 }
 0x303   : > { %962 = vlog2.f32 %v710_v11  ;;  %v714_v53 = vadd.f32 1.0, %v713_v45  ;;  %vm717_vm9 = vcmp.lt.f32.partialorder %v716_v56, 0.0004427343 }
 0x304   : > { %964 = vpow2.f32 %v704_v48  ;;  %v732_v6 = vadd.f32 1.0, %v731_v63  ;;  %vm735_vm11 = vcmp.lt.f32.partialorder %v734_v8, 0.0004427343 }
 0x305   : > { %966 = vlog2.f32 %v728_v51  ;;  %v715_v62 = vmul.f32 %v957_v43, %v714_v53 }
 0x306   : > { %v733_v19 = vmul.f32 %v959_v49, %v732_v6 }
 0x307   : > { %v961_v54 = vpop.eup %960 }
 0x308   : > { %v737_v58 = vadd.f32 1.0, %v961_v54  ;;  %v740_v3 = vmul.f32 -0.5, %v961_v54  ;;  %v743_v15 = vand.u32 2147483647, %v961_v54 }
 0x309   : > { %v963_v59 = vpop.eup %962 }
 0x30a   : > { %v965_v60 = vpop.eup %964  ;;  %v712_v61 = vmul.f32 0.6931472, %v963_v59  ;;  %968 = vlog2.f32 %v737_v58  ;;  %v741_v55 = vadd.f32 1.0, %v740_v3  ;;  %vm744_vm13 = vcmp.lt.f32.partialorder %v743_v15, 0.0004427343 }
 0x30b   : > { %v719_v0 = vadd.f32 1.0, %v965_v60  ;;  %v722_v2 = vmul.f32 -0.5, %v965_v60  ;;  %v967_v5 = vpop.eup %966  ;;  %v725_v14 = vand.u32 2147483647, %v965_v60 }
 0x30c   : > { %v718_v1 = vsel %vm717_vm9, %v715_v62, %v712_v61  ;;  %v730_v12 = vmul.f32 0.6931472, %v967_v5  ;;  %v742_v13 = vmul.f32 %v961_v54, %v741_v55 }
 0x30d   : > { %v746_v4 = vadd.f32 %v718_v1, %v690_v50  ;;  %970 = vlog2.f32 %v719_v0  ;;  %v723_v10 = vadd.f32 1.0, %v722_v2  ;;  %vm726_vm12 = vcmp.lt.f32.partialorder %v725_v14, 0.0004427343 }
 0x30e   : > { %v736_v22 = vsel %vm735_vm11, %v733_v19, %v730_v12 }
 0x30f   : > { %751 = vst.msk [vmem:[%s1202_s12] sm:$0xff] %vm750_vm10, %v746_v4  ;;  %v724_v21 = vmul.f32 %v965_v60, %v723_v10  ;;  %v748_v29 = vadd.f32 %v736_v22, %v692_v26 }
 0x310   : > { %v969_v7 = vpop.eup %968 }
 0x311   : > { %v739_v17 = vmul.f32 0.6931472, %v969_v7  ;;  %753 = vst.msk [vmem:[%s1202_s12 + $0x10] sm:$0xff] %vm750_vm10, %v748_v29 }
 0x313   : > { %v971_v18 = vpop.eup %970  ;;  %v745_v57 = vsel %vm744_vm13, %v742_v13, %v739_v17 }
 0x314   : > { %v721_v20 = vmul.f32 0.6931472, %v971_v18  ;;  %v749_v52 = vadd.f32 %v745_v57, %v693_v28 }
 0x316   : > { %v727_v27 = vsel %vm726_vm12, %v724_v21, %v721_v20  ;;  %754 = vst.msk [vmem:[%s1202_s12 + $0x18] sm:$0xff] %vm750_vm10, %v749_v52 }
 0x317   : > { %v747_v23 = vadd.f32 %v727_v27, %v691_v24 }
 0x319   : > { %752 = vst.msk [vmem:[%s1202_s12 + $0x8] sm:$0xff] %vm750_vm10, %v747_v23 }
 0x31a PF: > { %s16_s21 = sadd.s32 1, %s978_s21  }
 0x31b   : > { %p13_p4 = scmp.ge.s32.totalorder %s16_s21, 4  }
 0x31d   :  { %15 = sbr.rel (!%p13_p4) target bundleno = 1 (0x1), region = 74 }

</bundles_post_ra>
